<compile_context>
chip_gen: v5e
topology: v5e:2x2
jax: 0.10.0
libtpu: 0.0.40
codegen_flags: <defaults>
</compile_context>

<pallas_src>
import jax
import jax.numpy as jnp
from jax.experimental import pallas as pl
from jax.experimental.pallas import tpu as pltpu


def _mpnn_edge_kernel(aj_ref, bi_ref, edge_ref,
                      w_e5_ref, b_hh_ref,
                      w_mid_ref, b_mid_ref,
                      w5ih_ref, b5ih_ref,
                      out_ref):
    f32 = jnp.float32
    e = edge_ref[0]                    # (TI, N, E)   streamed edge tile
    aj = aj_ref[0]                     # (N, 2E)      x @ W1a          (sender term)
    bi = bi_ref[0]                     # (TI, 2E)     x @ W1b + b1     (receiver term)
    TI, N, E = e.shape
    M, E2, H3 = TI * N, 2 * E, 3 * E
    P = w_e5_ref.shape[1] - H3         # 128-aligned column offset of W_hh

    wdt = w_e5_ref.dtype               # matmul compute dtype (bf16 default / f32)

    e2 = e.reshape(M, E)               # flatten (i, j) pairs -> matmul M dimension
    e2m = e2.astype(wdt)

    # ---- single fused edge-fed matmul: [W1c | pad | W_hh] -------------------
    ew = jnp.dot(e2m, w_e5_ref[...], preferred_element_type=f32)    # (M, P+3E)
    pe = ew[:, :E2]                                                 # layer-1 edge term
    gh = ew[:, P:] + b_hh_ref[...]                                  # GRU hidden gates (f32, kept live)

    # ---- message layer 1 (concat decomposed; x-projections precomputed) ----
    pre1 = pe.reshape(TI, N, E2) + aj[None, :, :] + bi[:, None, :]
    h = jnp.maximum(pre1, 0.0).reshape(M, E2)

    # ---- message layers 2..4 (ReLU MLP over the flattened pair axis) -------
    for k in range(3):
        hk = jnp.dot(h.astype(wdt), w_mid_ref[k],
                     preferred_element_type=f32) + b_mid_ref[k]
        h = jnp.maximum(hk, 0.0)

    # ---- layer 5 folded into the GRU input projection -----------------------
    gi = jnp.dot(h.astype(wdt), w5ih_ref[...],
                 preferred_element_type=f32) + b5ih_ref[...]        # (M, 3E)

    # ---- GRUCell(input=message, hidden=edge); gate math in f32 --------------
    rz = jax.nn.sigmoid(gi[:, :E2] + gh[:, :E2])    # r and z at 2E lane width
    r = rz[:, :E]
    z = rz[:, E:]
    n = jnp.tanh(gi[:, E2:] + r * gh[:, E2:])
    h_new = (1.0 - z) * n + z * e2.astype(f32)

    out_ref[0] = h_new.reshape(TI, N, E).astype(out_ref.dtype)


def _round_up(v, m):
    return -(-v // m) * m


def _vmem_capacity_bytes():
    try:
        info = pltpu.get_tpu_info()
        cap = int(getattr(info, "vmem_capacity_bytes", 0) or 0)
        if cap > 0:
            return cap
    except Exception:
        pass
    return 64 * 1024 * 1024            # conservative fallback: v7x per-TC VMEM


def _choose_block_i(B, N, E, edge_itemsize, out_itemsize, budget_bytes):
    """Largest receiver-atom tile TI (divisor of N, %8 or ==N) whose per-step
    VMEM footprint (double-buffered lane-padded blocks + live in-kernel f32
    intermediates + slack) fits the budget."""
    lane = 128
    e_pad = _round_up(E, lane)
    e2_pad = _round_up(2 * E, lane)

    def est(ti):
        m = ti * N
        b = 2 * ti * N * e_pad * edge_itemsize       # edge in (double-buffered, lane-padded)
        b += 2 * ti * N * e_pad * out_itemsize       # out     (double-buffered, lane-padded)
        b += 2 * ti * e2_pad * 4                     # bi tile
        b += 2 * N * e2_pad * 4                      # aj (all senders)
        b += m * lane * 4 * 7                        # live f32 intermediates (ew/gh/h/pre1/gi/...)
        b += m * e_pad * 4                           # e2 / e2m staging
        b += 2 << 20                                 # weights + compiler slack
        return b

    cands = [d for d in range(N, 0, -1)
             if N % d == 0 and (d % 8 == 0 or d == N)]
    if B < 2:                                        # v7x: keep both TensorCores busy
        multi = [d for d in cands if N // d >= 2]
        if multi:
            cands = multi
    fitting = [d for d in cands if est(d) <= budget_bytes]
    return fitting[0] if fitting else cands[-1]


def mpnn_edge_pallas(edge, adj, x, params, *, block_i=None,
                     compute_dtype=jnp.bfloat16, stream_dtype=None):
    """Pallas TPU forward for MPNN_edge.forward(edge, adj, x) -> (B, N, N, E).

    compute_dtype: dtype of the matmul weights/operands (accumulation, biases
        and gate math are always f32).  None -> full f32 (closest match to the
        PyTorch module); default bf16 is the native MXU fast path.
    stream_dtype:  optional dtype for the streamed edge tensor (e.g. bf16 to
        halve HBM traffic).  None keeps it at the input dtype so the GRU
        hidden/residual path sees full-precision edge values.
    """
    del adj  # unused by MPNN_edge.forward (kept for signature parity)
    B, N_in, F = x.shape
    E = edge.shape[-1]
    if E != F:
        raise ValueError("MPNN_edge's GRUCell(F, F) requires n_edge_feature == n_atom_feature")
    E2, H3 = 2 * E, 3 * E
    hp = jax.lax.Precision.HIGHEST
    out_dtype = edge.dtype
    cdt = jnp.dtype(compute_dtype) if compute_dtype is not None else jnp.float32

    # --- pad the atom axis to a multiple of 8: the receiver tile then always
    #     satisfies the (8,128) BlockSpec rule for any N; pairs are independent
    #     so padded rows/cols are simply sliced off at the end.
    N = _round_up(N_in, 8)
    if N != N_in:
        p = N - N_in
        x = jnp.pad(x, ((0, 0), (0, p), (0, 0)))
        edge = jnp.pad(edge, ((0, 0), (0, p), (0, p), (0, 0)))

    # --- host-side weight preprocessing / fusion -----------------------------
    w1_t = params["w1_t"]                                        # (2F+E, 2E)
    w1a, w1b, w1c = w1_t[:F], w1_t[F:2 * F], w1_t[2 * F:]

    # per-atom halves of the first message Linear, hoisted out of the kernel
    xf = x.astype(jnp.float32)
    aj = jnp.dot(xf, w1a, precision=hp)                          # (B, N, 2E)  sender term
    bi = jnp.dot(xf, w1b, precision=hp) + params["b1"]           # (B, N, 2E)  receiver term (+b1)

    # fused edge-fed weight: [W1c | zero pad to 128 | W_hh]; the pad keeps both
    # output slices vreg-aligned inside the kernel at no extra MXU cost.
    P = _round_up(E2, 128)
    w_e5 = jnp.zeros((E, P + H3), jnp.float32)
    w_e5 = w_e5.at[:, :E2].set(w1c).at[:, P:].set(params["w_hh_t"])
    b_hh = params["b_hh"].reshape(1, H3)

    w_mid = jnp.stack([params["w2_t"], params["w3_t"], params["w4_t"]])      # (3, 2E, 2E)
    b_mid = jnp.stack([params["b2"], params["b3"], params["b4"]]).reshape(3, 1, E2)

    # fold the last message Linear into the GRU input projection (exact algebra)
    w5ih = jnp.dot(params["w5_t"], params["w_ih_t"], precision=hp)           # (2E, 3E)
    b5ih = (jnp.dot(params["b5"].reshape(1, E), params["w_ih_t"], precision=hp)
            + params["b_ih"].reshape(1, H3))                                 # (1, 3E)

    w_e5, w_mid, w5ih = (a.astype(cdt) for a in (w_e5, w_mid, w5ih))
    if stream_dtype is not None:
        edge = edge.astype(stream_dtype)

    # --- generation-aware receiver-atom tiling --------------------------------
    vmem_cap = _vmem_capacity_bytes()
    budget = int(vmem_cap * 0.55)
    if block_i is None:
        block_i = _choose_block_i(B, N, E, edge.dtype.itemsize,
                                  jnp.dtype(out_dtype).itemsize, budget)
    if N % block_i or not (block_i % 8 == 0 or block_i == N):
        raise ValueError(f"block_i={block_i} must divide N={N} and be a multiple of 8")
    TI = block_i
    grid = (B, N // TI)

    def full(shape):
        nd = len(shape)
        return pl.BlockSpec(shape, lambda b, t, _nd=nd: (0,) * _nd)

    in_specs = [
        pl.BlockSpec((1, N, E2), lambda b, t: (b, 0, 0)),          # aj  (all senders)
        pl.BlockSpec((1, TI, E2), lambda b, t: (b, t, 0)),         # bi  (receiver tile)
        pl.BlockSpec((1, TI, N, E), lambda b, t: (b, t, 0, 0)),    # edge tile
        full(w_e5.shape), full(b_hh.shape),
        full(w_mid.shape), full(b_mid.shape),
        full(w5ih.shape), full(b5ih.shape),
    ]
    out_spec = pl.BlockSpec((1, TI, N, E), lambda b, t: (b, t, 0, 0))

    # advisory cost estimate for XLA's scheduler
    pair_macs = E * (P + H3) + 3 * E2 * E2 + E2 * H3
    resident = (aj, bi, w_e5, b_hh, w_mid, b_mid, w5ih, b5ih)
    resident_bytes = sum(int(a.size) * a.dtype.itemsize for a in resident)
    io_bytes = (B * N * N * E * (edge.dtype.itemsize + jnp.dtype(out_dtype).itemsize)
                + resident_bytes)
    cost = pl.CostEstimate(
        flops=int(2 * B * N * N * pair_macs + B * N * N * 24 * E),
        transcendentals=int(B * N * N * 3 * E),
        bytes_accessed=int(io_bytes))

    out = pl.pallas_call(
        _mpnn_edge_kernel,
        out_shape=jax.ShapeDtypeStruct((B, N, N, E), out_dtype),
        grid_spec=pltpu.PrefetchScalarGridSpec(
            num_scalar_prefetch=0,
            grid=grid,
            in_specs=in_specs,
            out_specs=out_spec,
        ),
        compiler_params=pltpu.CompilerParams(
            dimension_semantics=("parallel", "parallel"),
            vmem_limit_bytes=int(min(vmem_cap * 3 // 4, 112 * 1024 * 1024))),
        cost_estimate=cost,
    )(aj, bi, edge, w_e5, b_hh, w_mid, b_mid, w5ih, b5ih)

    if N != N_in:
        out = out[:, :N_in, :N_in, :]
    return out


def mpnn_edge_reference(edge, adj, x, params):
    """Literal JAX translation of the PyTorch MPNN_edge.forward (correctness check)."""
    del adj
    B, N, F = x.shape
    E = edge.shape[-1]
    hp = jax.lax.Precision.HIGHEST
    h1 = jnp.broadcast_to(x[:, None, :, :], (B, N, N, F))   # x.unsqueeze(1).repeat
    h2 = jnp.broadcast_to(x[:, :, None, :], (B, N, N, F))   # x.unsqueeze(2).repeat
    h = jnp.concatenate([h1, h2, edge], axis=-1)
    h = jax.nn.relu(jnp.dot(h, params["w1_t"], precision=hp) + params["b1"])
    h = jax.nn.relu(jnp.dot(h, params["w2_t"], precision=hp) + params["b2"])
    h = jax.nn.relu(jnp.dot(h, params["w3_t"], precision=hp) + params["b3"])
    h = jax.nn.relu(jnp.dot(h, params["w4_t"], precision=hp) + params["b4"])
    msg = jnp.dot(h, params["w5_t"], precision=hp) + params["b5"]
    rm = msg.reshape(-1, E)
    re = edge.reshape(-1, E)
    gi = jnp.dot(rm, params["w_ih_t"], precision=hp) + params["b_ih"]
    gh = jnp.dot(re, params["w_hh_t"], precision=hp) + params["b_hh"]
    r = jax.nn.sigmoid(gi[:, :E] + gh[:, :E])
    z = jax.nn.sigmoid(gi[:, E:2 * E] + gh[:, E:2 * E])
    n = jnp.tanh(gi[:, 2 * E:] + r * gh[:, 2 * E:])
    out = (1.0 - z) * n + z * re
    return out.reshape(B, N, N, E)


def init_params(key, n_edge_feature, n_atom_feature):
    E, F = n_edge_feature, n_atom_feature
    ks = jax.random.split(key, 14)
    s = 0.1

    def w(k, shape):
        return s * jax.random.normal(k, shape, jnp.float32)

    return {
        # cal_message: Linear(2F+E, 2E) -> 3x Linear(2E, 2E) -> Linear(2E, E)
        # (stored transposed so y = x @ W^T + b == x @ w_t + b)
        "w1_t": w(ks[0], (2 * F + E, 2 * E)), "b1": w(ks[1], (2 * E,)),
        "w2_t": w(ks[2], (2 * E, 2 * E)),     "b2": w(ks[3], (2 * E,)),
        "w3_t": w(ks[4], (2 * E, 2 * E)),     "b3": w(ks[5], (2 * E,)),
        "w4_t": w(ks[6], (2 * E, 2 * E)),     "b4": w(ks[7], (2 * E,)),
        "w5_t": w(ks[8], (2 * E, E)),         "b5": w(ks[9], (E,)),
        # nn.GRUCell(F, F): weight_ih / weight_hh are (3F, F) in torch -> transposed
        "w_ih_t": w(ks[10], (F, 3 * F)), "b_ih": w(ks[11], (3 * F,)),
        "w_hh_t": w(ks[12], (F, 3 * F)), "b_hh": w(ks[13], (3 * F,)),
    }


if __name__ == "__main__":
    # n_edge_feature must equal n_atom_feature for MPNN_edge's GRUCell call.
    B, N, F = 2, 8, 32
    E = F

    key = jax.random.PRNGKey(0)
    k_x, k_e, k_a, k_p = jax.random.split(key, 4)

    x = jax.random.normal(k_x, (B, N, F), jnp.float32)
    edge = jax.random.normal(k_e, (B, N, N, E), jnp.float32)
    adj = (jax.random.uniform(k_a, (B, N, N)) > 0.5).astype(jnp.float32)  # unused by forward
    params = init_params(k_p, E, F)

    ref = mpnn_edge_reference(edge, adj, x, params)

    # 1) default fast path: bf16 matmul weights/operands, f32 gate math & streams
    out = jax.block_until_ready(mpnn_edge_pallas(edge, adj, x, params))
    assert out.shape == (B, N, N, E)
    err = float(jnp.max(jnp.abs(out - ref)))
    assert err < 5e-2, f"bf16-compute path: max abs err = {err}"

    # 2) full-f32 path (closest match to the PyTorch module)
    out32 = jax.block_until_ready(
        mpnn_edge_pallas(edge, adj, x, params, compute_dtype=None))
    err32 = float(jnp.max(jnp.abs(out32 - ref)))
    assert err32 < 1e-3, f"f32 path: max abs err = {err32}"

    # 3) awkward N (exercises the N->multiple-of-8 padding path) + bf16-streamed edge
    B2, N2 = 1, 6
    x2 = jax.random.normal(jax.random.PRNGKey(1), (B2, N2, F), jnp.float32)
    edge2 = jax.random.normal(jax.random.PRNGKey(2), (B2, N2, N2, E), jnp.float32)
    adj2 = jnp.ones((B2, N2, N2), jnp.float32)
    ref2 = mpnn_edge_reference(edge2, adj2, x2, params)
    out2 = jax.block_until_ready(
        mpnn_edge_pallas(edge2, adj2, x2, params, stream_dtype=jnp.bfloat16))
    assert out2.shape == (B2, N2, N2, E)
    err2 = float(jnp.max(jnp.abs(out2 - ref2)))
    assert err2 < 8e-2, f"padded / bf16-stream path: max abs err = {err2}"

    print("KERNEL_OK")
</pallas_src>

<mosaic_0001>
module attributes {stable_mosaic.version = 11 : i64} {
  func.func @_mpnn_edge_kernel(%arg0: i32, %arg1: i32, %arg2: memref<1x8x64xf32, #tpu.memory_space<vmem>>, %arg3: memref<1x8x64xf32, #tpu.memory_space<vmem>>, %arg4: memref<1x8x8x32xf32, #tpu.memory_space<vmem>>, %arg5: memref<32x224xbf16, #tpu.memory_space<vmem>>, %arg6: memref<1x96xf32, #tpu.memory_space<vmem>>, %arg7: memref<3x64x64xbf16, #tpu.memory_space<vmem>>, %arg8: memref<3x1x64xf32, #tpu.memory_space<vmem>>, %arg9: memref<64x96xbf16, #tpu.memory_space<vmem>>, %arg10: memref<1x96xf32, #tpu.memory_space<vmem>>, %arg11: memref<1x8x8x32xf32, #tpu.memory_space<vmem>>) attributes {dimension_semantics = [#tpu.dimension_semantics<parallel>, #tpu.dimension_semantics<parallel>], iteration_bounds = array<i64: 2, 1>, scalar_prefetch = 0 : i64, scratch_operands = 0 : i64, tpu.core_type = #tpu.core_type<tc>, window_params = [{transform_indices = @transform_0, window_bounds = array<i64: 1, 8, 64>}, {transform_indices = @transform_1, window_bounds = array<i64: 1, 8, 64>}, {transform_indices = @transform_2, window_bounds = array<i64: 1, 8, 8, 32>}, {pipeline_mode = #tpu.pipeline_mode<synchronous>, transform_indices = @transform_3, window_bounds = array<i64: 32, 224>}, {pipeline_mode = #tpu.pipeline_mode<synchronous>, transform_indices = @transform_4, window_bounds = array<i64: 1, 96>}, {pipeline_mode = #tpu.pipeline_mode<synchronous>, transform_indices = @transform_5, window_bounds = array<i64: 3, 64, 64>}, {pipeline_mode = #tpu.pipeline_mode<synchronous>, transform_indices = @transform_6, window_bounds = array<i64: 3, 1, 64>}, {pipeline_mode = #tpu.pipeline_mode<synchronous>, transform_indices = @transform_7, window_bounds = array<i64: 64, 96>}, {pipeline_mode = #tpu.pipeline_mode<synchronous>, transform_indices = @transform_8, window_bounds = array<i64: 1, 96>}, {transform_indices = @transform_9, window_bounds = array<i64: 1, 8, 8, 32>}]} {
    %c0 = arith.constant 0 : index
    %c0_0 = arith.constant 0 : index
    %c0_1 = arith.constant 0 : index
    %c0_2 = arith.constant 0 : index
    %0 = vector.load %arg4[%c0, %c0_0, %c0_1, %c0_2] : memref<1x8x8x32xf32, #tpu.memory_space<vmem>>, vector<1x8x8x32xf32>
    %1 = vector.shape_cast %0 : vector<1x8x8x32xf32> to vector<8x8x32xf32>
    %c0_3 = arith.constant 0 : index
    %c0_4 = arith.constant 0 : index
    %c0_5 = arith.constant 0 : index
    %2 = vector.load %arg2[%c0_3, %c0_4, %c0_5] : memref<1x8x64xf32, #tpu.memory_space<vmem>>, vector<1x8x64xf32>
    %3 = vector.shape_cast %2 : vector<1x8x64xf32> to vector<8x64xf32>
    %c0_6 = arith.constant 0 : index
    %c0_7 = arith.constant 0 : index
    %c0_8 = arith.constant 0 : index
    %4 = vector.load %arg3[%c0_6, %c0_7, %c0_8] : memref<1x8x64xf32, #tpu.memory_space<vmem>>, vector<1x8x64xf32>
    %5 = vector.shape_cast %4 : vector<1x8x64xf32> to vector<8x64xf32>
    %6 = vector.shape_cast %1 : vector<8x8x32xf32> to vector<64x32xf32>
    %7 = arith.truncf %6 : vector<64x32xf32> to vector<64x32xbf16>
    %c0_9 = arith.constant 0 : index
    %c0_10 = arith.constant 0 : index
    %8 = vector.load %arg5[%c0_9, %c0_10] : memref<32x224xbf16, #tpu.memory_space<vmem>>, vector<32x224xbf16>
    %cst = arith.constant dense<0.000000e+00> : vector<64x224xf32>
    %9 = tpu.matmul %7, %8, %cst {dimension_numbers = #tpu.dot_dimension_numbers<[1], [0], [0], [1], [0, 0, 1, 1], [], []>} : vector<64x32xbf16>, vector<32x224xbf16>, vector<64x224xf32> -> vector<64x224xf32>
    %10 = vector.extract_strided_slice %9 {offsets = [0, 0], sizes = [64, 64], strides = [1, 1]} : vector<64x224xf32> to vector<64x64xf32>
    %11 = vector.extract_strided_slice %9 {offsets = [0, 128], sizes = [64, 96], strides = [1, 1]} : vector<64x224xf32> to vector<64x96xf32>
    %c0_11 = arith.constant 0 : index
    %c0_12 = arith.constant 0 : index
    %12 = vector.load %arg6[%c0_11, %c0_12] : memref<1x96xf32, #tpu.memory_space<vmem>>, vector<1x96xf32>
    %13 = vector.broadcast %12 : vector<1x96xf32> to vector<64x96xf32>
    %14 = arith.addf %11, %13 : vector<64x96xf32>
    %15 = vector.shape_cast %10 : vector<64x64xf32> to vector<8x8x64xf32>
    %16 = vector.shape_cast %3 : vector<8x64xf32> to vector<1x8x64xf32>
    %17 = vector.broadcast %16 : vector<1x8x64xf32> to vector<8x8x64xf32>
    %18 = arith.addf %15, %17 : vector<8x8x64xf32>
    %19 = vector.shape_cast %5 : vector<8x64xf32> to vector<8x1x64xf32>
    %20 = vector.broadcast %19 : vector<8x1x64xf32> to vector<8x8x64xf32>
    %21 = arith.addf %18, %20 : vector<8x8x64xf32>
    %cst_13 = arith.constant 0.000000e+00 : f32
    %22 = vector.broadcast %cst_13 : f32 to vector<8x8x64xf32>
    %23 = arith.maximumf %21, %22 : vector<8x8x64xf32>
    %24 = vector.shape_cast %23 : vector<8x8x64xf32> to vector<64x64xf32>
    %25 = arith.truncf %24 : vector<64x64xf32> to vector<64x64xbf16>
    %c0_14 = arith.constant 0 : index
    %c0_15 = arith.constant 0 : index
    %c0_16 = arith.constant 0 : index
    %26 = vector.load %arg7[%c0_14, %c0_15, %c0_16] : memref<3x64x64xbf16, #tpu.memory_space<vmem>>, vector<1x64x64xbf16>
    %27 = vector.shape_cast %26 : vector<1x64x64xbf16> to vector<64x64xbf16>
    %cst_17 = arith.constant dense<0.000000e+00> : vector<64x64xf32>
    %28 = tpu.matmul %25, %27, %cst_17 {dimension_numbers = #tpu.dot_dimension_numbers<[1], [0], [0], [1], [0, 0, 1, 1], [], []>} : vector<64x64xbf16>, vector<64x64xbf16>, vector<64x64xf32> -> vector<64x64xf32>
    %c0_18 = arith.constant 0 : index
    %c0_19 = arith.constant 0 : index
    %c0_20 = arith.constant 0 : index
    %29 = vector.load %arg8[%c0_18, %c0_19, %c0_20] : memref<3x1x64xf32, #tpu.memory_space<vmem>>, vector<1x1x64xf32>
    %30 = vector.shape_cast %29 : vector<1x1x64xf32> to vector<1x64xf32>
    %31 = vector.broadcast %30 : vector<1x64xf32> to vector<64x64xf32>
    %32 = arith.addf %28, %31 : vector<64x64xf32>
    %cst_21 = arith.constant 0.000000e+00 : f32
    %33 = vector.broadcast %cst_21 : f32 to vector<64x64xf32>
    %34 = arith.maximumf %32, %33 : vector<64x64xf32>
    %35 = arith.truncf %34 : vector<64x64xf32> to vector<64x64xbf16>
    %c1 = arith.constant 1 : index
    %c0_22 = arith.constant 0 : index
    %c0_23 = arith.constant 0 : index
    %36 = vector.load %arg7[%c1, %c0_22, %c0_23] : memref<3x64x64xbf16, #tpu.memory_space<vmem>>, vector<1x64x64xbf16>
    %37 = vector.shape_cast %36 : vector<1x64x64xbf16> to vector<64x64xbf16>
    %cst_24 = arith.constant dense<0.000000e+00> : vector<64x64xf32>
    %38 = tpu.matmul %35, %37, %cst_24 {dimension_numbers = #tpu.dot_dimension_numbers<[1], [0], [0], [1], [0, 0, 1, 1], [], []>} : vector<64x64xbf16>, vector<64x64xbf16>, vector<64x64xf32> -> vector<64x64xf32>
    %c1_25 = arith.constant 1 : index
    %c0_26 = arith.constant 0 : index
    %c0_27 = arith.constant 0 : index
    %39 = vector.load %arg8[%c1_25, %c0_26, %c0_27] : memref<3x1x64xf32, #tpu.memory_space<vmem>>, vector<1x1x64xf32>
    %40 = vector.shape_cast %39 : vector<1x1x64xf32> to vector<1x64xf32>
    %41 = vector.broadcast %40 : vector<1x64xf32> to vector<64x64xf32>
    %42 = arith.addf %38, %41 : vector<64x64xf32>
    %cst_28 = arith.constant 0.000000e+00 : f32
    %43 = vector.broadcast %cst_28 : f32 to vector<64x64xf32>
    %44 = arith.maximumf %42, %43 : vector<64x64xf32>
    %45 = arith.truncf %44 : vector<64x64xf32> to vector<64x64xbf16>
    %c2 = arith.constant 2 : index
    %c0_29 = arith.constant 0 : index
    %c0_30 = arith.constant 0 : index
    %46 = vector.load %arg7[%c2, %c0_29, %c0_30] : memref<3x64x64xbf16, #tpu.memory_space<vmem>>, vector<1x64x64xbf16>
    %47 = vector.shape_cast %46 : vector<1x64x64xbf16> to vector<64x64xbf16>
    %cst_31 = arith.constant dense<0.000000e+00> : vector<64x64xf32>
    %48 = tpu.matmul %45, %47, %cst_31 {dimension_numbers = #tpu.dot_dimension_numbers<[1], [0], [0], [1], [0, 0, 1, 1], [], []>} : vector<64x64xbf16>, vector<64x64xbf16>, vector<64x64xf32> -> vector<64x64xf32>
    %c2_32 = arith.constant 2 : index
    %c0_33 = arith.constant 0 : index
    %c0_34 = arith.constant 0 : index
    %49 = vector.load %arg8[%c2_32, %c0_33, %c0_34] : memref<3x1x64xf32, #tpu.memory_space<vmem>>, vector<1x1x64xf32>
    %50 = vector.shape_cast %49 : vector<1x1x64xf32> to vector<1x64xf32>
    %51 = vector.broadcast %50 : vector<1x64xf32> to vector<64x64xf32>
    %52 = arith.addf %48, %51 : vector<64x64xf32>
    %cst_35 = arith.constant 0.000000e+00 : f32
    %53 = vector.broadcast %cst_35 : f32 to vector<64x64xf32>
    %54 = arith.maximumf %52, %53 : vector<64x64xf32>
    %55 = arith.truncf %54 : vector<64x64xf32> to vector<64x64xbf16>
    %c0_36 = arith.constant 0 : index
    %c0_37 = arith.constant 0 : index
    %56 = vector.load %arg9[%c0_36, %c0_37] : memref<64x96xbf16, #tpu.memory_space<vmem>>, vector<64x96xbf16>
    %cst_38 = arith.constant dense<0.000000e+00> : vector<64x96xf32>
    %57 = tpu.matmul %55, %56, %cst_38 {dimension_numbers = #tpu.dot_dimension_numbers<[1], [0], [0], [1], [0, 0, 1, 1], [], []>} : vector<64x64xbf16>, vector<64x96xbf16>, vector<64x96xf32> -> vector<64x96xf32>
    %c0_39 = arith.constant 0 : index
    %c0_40 = arith.constant 0 : index
    %58 = vector.load %arg10[%c0_39, %c0_40] : memref<1x96xf32, #tpu.memory_space<vmem>>, vector<1x96xf32>
    %59 = vector.broadcast %58 : vector<1x96xf32> to vector<64x96xf32>
    %60 = arith.addf %57, %59 : vector<64x96xf32>
    %61 = vector.extract_strided_slice %60 {offsets = [0, 0], sizes = [64, 64], strides = [1, 1]} : vector<64x96xf32> to vector<64x64xf32>
    %62 = vector.extract_strided_slice %14 {offsets = [0, 0], sizes = [64, 64], strides = [1, 1]} : vector<64x96xf32> to vector<64x64xf32>
    %63 = arith.addf %61, %62 : vector<64x64xf32>
    %64 = arith.negf %63 : vector<64x64xf32>
    %65 = math.exp %64 : vector<64x64xf32>
    %cst_41 = arith.constant 1.000000e+00 : f32
    %66 = vector.broadcast %cst_41 : f32 to vector<64x64xf32>
    %67 = arith.addf %66, %65 : vector<64x64xf32>
    %68 = arith.divf %66, %67 : vector<64x64xf32>
    %69 = vector.extract_strided_slice %68 {offsets = [0, 0], sizes = [64, 32], strides = [1, 1]} : vector<64x64xf32> to vector<64x32xf32>
    %70 = vector.extract_strided_slice %68 {offsets = [0, 32], sizes = [64, 32], strides = [1, 1]} : vector<64x64xf32> to vector<64x32xf32>
    %71 = vector.extract_strided_slice %60 {offsets = [0, 64], sizes = [64, 32], strides = [1, 1]} : vector<64x96xf32> to vector<64x32xf32>
    %72 = vector.extract_strided_slice %14 {offsets = [0, 64], sizes = [64, 32], strides = [1, 1]} : vector<64x96xf32> to vector<64x32xf32>
    %73 = arith.mulf %69, %72 : vector<64x32xf32>
    %74 = arith.addf %71, %73 : vector<64x32xf32>
    %75 = math.tanh %74 : vector<64x32xf32>
    %cst_42 = arith.constant 1.000000e+00 : f32
    %76 = vector.broadcast %cst_42 : f32 to vector<64x32xf32>
    %77 = arith.subf %76, %70 : vector<64x32xf32>
    %78 = arith.mulf %77, %75 : vector<64x32xf32>
    %79 = arith.mulf %70, %6 : vector<64x32xf32>
    %80 = arith.addf %78, %79 : vector<64x32xf32>
    %81 = vector.shape_cast %80 : vector<64x32xf32> to vector<8x8x32xf32>
    %c0_43 = arith.constant 0 : index
    %c0_44 = arith.constant 0 : index
    %c0_45 = arith.constant 0 : index
    %c0_46 = arith.constant 0 : index
    %82 = vector.load %arg11[%c0_43, %c0_44, %c0_45, %c0_46] : memref<1x8x8x32xf32, #tpu.memory_space<vmem>>, vector<1x8x8x32xf32>
    %83 = vector.shape_cast %82 : vector<1x8x8x32xf32> to vector<8x8x32xf32>
    %84 = vector.shape_cast %81 : vector<8x8x32xf32> to vector<1x8x8x32xf32>
    tpu.vector_store %arg11[%c0_43, %c0_44, %c0_45, %c0_46], %84 {strides = array<i32>} : memref<1x8x8x32xf32, #tpu.memory_space<vmem>>, vector<1x8x8x32xf32>,
    return
  }
  func.func @transform_0(%arg0: i32, %arg1: i32) -> (i32, i32, i32) {
    %c0_i32 = arith.constant 0 : i32
    %c0_i32_0 = arith.constant 0 : i32
    %c0_i32_1 = arith.constant 0 : i32
    return %arg0, %c0_i32, %c0_i32_0 : i32, i32, i32
  }
  func.func @transform_1(%arg0: i32, %arg1: i32) -> (i32, i32, i32) {
    %c0_i32 = arith.constant 0 : i32
    %c0_i32_0 = arith.constant 0 : i32
    return %arg0, %arg1, %c0_i32 : i32, i32, i32
  }
  func.func @transform_2(%arg0: i32, %arg1: i32) -> (i32, i32, i32, i32) {
    %c0_i32 = arith.constant 0 : i32
    %c0_i32_0 = arith.constant 0 : i32
    %c0_i32_1 = arith.constant 0 : i32
    return %arg0, %arg1, %c0_i32, %c0_i32_0 : i32, i32, i32, i32
  }
  func.func @transform_3(%arg0: i32, %arg1: i32) -> (i32, i32) {
    %c0_i32 = arith.constant 0 : i32
    %c0_i32_0 = arith.constant 0 : i32
    %c0_i32_1 = arith.constant 0 : i32
    return %c0_i32, %c0_i32_0 : i32, i32
  }
  func.func @transform_4(%arg0: i32, %arg1: i32) -> (i32, i32) {
    %c0_i32 = arith.constant 0 : i32
    %c0_i32_0 = arith.constant 0 : i32
    %c0_i32_1 = arith.constant 0 : i32
    return %c0_i32, %c0_i32_0 : i32, i32
  }
  func.func @transform_5(%arg0: i32, %arg1: i32) -> (i32, i32, i32) {
    %c0_i32 = arith.constant 0 : i32
    %c0_i32_0 = arith.constant 0 : i32
    %c0_i32_1 = arith.constant 0 : i32
    %c0_i32_2 = arith.constant 0 : i32
    return %c0_i32, %c0_i32_0, %c0_i32_1 : i32, i32, i32
  }
  func.func @transform_6(%arg0: i32, %arg1: i32) -> (i32, i32, i32) {
    %c0_i32 = arith.constant 0 : i32
    %c0_i32_0 = arith.constant 0 : i32
    %c0_i32_1 = arith.constant 0 : i32
    %c0_i32_2 = arith.constant 0 : i32
    return %c0_i32, %c0_i32_0, %c0_i32_1 : i32, i32, i32
  }
  func.func @transform_7(%arg0: i32, %arg1: i32) -> (i32, i32) {
    %c0_i32 = arith.constant 0 : i32
    %c0_i32_0 = arith.constant 0 : i32
    %c0_i32_1 = arith.constant 0 : i32
    return %c0_i32, %c0_i32_0 : i32, i32
  }
  func.func @transform_8(%arg0: i32, %arg1: i32) -> (i32, i32) {
    %c0_i32 = arith.constant 0 : i32
    %c0_i32_0 = arith.constant 0 : i32
    %c0_i32_1 = arith.constant 0 : i32
    return %c0_i32, %c0_i32_0 : i32, i32
  }
  func.func @transform_9(%arg0: i32, %arg1: i32) -> (i32, i32, i32, i32) {
    %c0_i32 = arith.constant 0 : i32
    %c0_i32_0 = arith.constant 0 : i32
    %c0_i32_1 = arith.constant 0 : i32
    return %arg0, %arg1, %c0_i32, %c0_i32_0 : i32, i32, i32, i32
  }
}

</mosaic_0001>

<bundles_post_ra>
// kernel: tpu_custom_call.1
= control target key start
LH: loop header
LB: loop body
LE: loop exit
PB: predicated region body
PF: predicated region fallthrough
CT: control target
= control target key end

     0   :  { %s2755_s0 = inlined_call_operand.hbm [shape: f32[2,8,64], index: 0, kind: input, shape index: {}]   ;;  %s2756_s1 = inlined_call_operand.hbm [shape: f32[2,8,64], index: 1, kind: input, shape index: {}]   ;;  %s2757_s2 = inlined_call_operand.hbm [shape: f32[2,8,8,32], index: 2, kind: input, shape index: {}]   ;;  %s2758_s3 = inlined_call_operand.hbm [shape: bf16[32,224], index: 3, kind: input, shape index: {}]   ;;  %s2759_s4 = inlined_call_operand.vmem [shape: f32[1,96], index: 4, kind: input, shape index: {}]   ;;  %s2760_s5 = inlined_call_operand.hbm [shape: bf16[3,64,64], index: 5, kind: input, shape index: {}]   ;;  %s2761_s6 = inlined_call_operand.vmem [shape: f32[3,1,64], index: 6, kind: input, shape index: {}]   ;;  %s2762_s7 = inlined_call_operand.hbm [shape: bf16[64,96], index: 7, kind: input, shape index: {}]   ;;  %s2763_s8 = inlined_call_operand.vmem [shape: f32[1,96], index: 8, kind: input, shape index: {}]   ;;  %s2764_s9 = inlined_call_operand.hbm [shape: f32[2,8,8,32], index: 9, kind: output, shape index: {}]  }
   0x1   :  { %2778 = sst [smem:[#allocation27_spill]] %s2756_s1 }
   0x2   :  { %2779 = sst [smem:[#allocation28_spill]] %s2758_s3 }
   0x3   :  { %2780 = sst [smem:[#allocation29_spill]] %s2760_s5 }
   0x4   :  { %2781 = sst [smem:[#allocation30_spill]] %s2762_s7 }
   0x5   :  { %2782 = sst [smem:[#allocation31_spill]] %s2764_s9 }
   0x6   :  { %14 = vsyncpa [#allocation3], 0 }
   0x7   :  { %16 = vsyncpa [#allocation3 + $0x1], 0 }
   0x8   :  { %17 = vsyncpa [#allocation6], 0 }
   0x9   :  { %19 = vsyncpa [#allocation6 + $0x1], 0 }
   0xa   :  { %20 = vsyncpa [#allocation9], 0 }
   0xb   :  { %21 = vsyncpa [#allocation12], 0 }
   0xc   :  { %22 = vsyncpa [#allocation4], 0 }
   0xd   :  { %24 = vsyncpa [#allocation4 + $0x1], 0  ;;  %s2256_s30 = smov 0   ;;  %s2258_s10 = smov 0  }
   0xe   :  { %s2260_s11 = smov 0   ;;  %s2262_s12 = smov 0  }
   0xf   :  { %s2264_s13 = smov 0   ;;  %s2266_s14 = smov 0  }
  0x10 LB: > { %2783 = sst [smem:[#allocation19_spill]] %s2172_s30  ;;  %s2287_s15 = sadd.s32 4294967295, %s2192_s14   ;;  %s2192_s14 = sphi %s2266_s14, %s30_s14   ;;  %s2188_s13 = sphi %s2264_s13, %s2819_s13   ;;  %s2184_s12 = sphi %s2262_s12, %s2818_s12   ;;  %s2180_s11 = sphi %s2260_s11, %s2814_s11   ;;  %s2176_s10 = sphi %s2258_s10, %s2817_s10   ;;  %s2172_s30 = sphi %s2256_s30, %s2816_s30  }
  0x11   : > { %2784 = sst [smem:[#allocation20_spill]] %s2180_s11  ;;  %p1588_p0 = scmp.ge.s32.totalorder %s2192_s14, 1 }
  0x12   : > { %2785 = sst [smem:[#allocation21_spill]] %s2184_s12  ;;  %p63_p1 = scmp.eq.s32.totalorder %s2287_s15, 0 }
  0x13   : > { %2786 = sst [smem:[#allocation22_spill]] %s2192_s14  ;;  %p283_p2 = scmp.lt.s32.totalorder %s2192_s14, 3 }
  0x14   : > { %s2787_s3 = sld [smem:[#allocation28_spill]]  ;;  %s2194_s20 = smov [#allocation8]  }
  0x15   : > { %p2295_p3 = pnand %p1588_p0, %p283_p2  ;;  %s296_s21 = sshll.u32 %s2194_s20, 4  ;;  %s297_s21 = int_to_ptr.vmem [resolvable:$true] %s296_s21 }
  0x16   : > { %s2765_s23 = smov 128   ;;  %s2766_s24 = smov 8  }
  0x17   : > { %p1773_p4 = pneg %p2295_p3  ;;  %s1587_s25 = sadd.s32 4294967294, %s2192_s14  }
  0x18   : > { %s42_s26 = sadd.s32 1, %s2188_s13  ;;  %s49_s27 = sadd.s32 1, %s2180_s11 }
  0x19   : > { %p2303_p5 = pnand %p1773_p4, %p63_p1  ;;  %p44_p7 = scmp.ge.s32.totalorder %s42_s26, 2 }
  0x1a   : > { %s294_s18 = sshll.u32 %s2787_s3, 4  ;;  %p56_p8 = scmp.ne.s32.totalorder %s2180_s11, %s2176_s10  ;;  %s295_s18 = int_to_ptr.hbm [resolvable:$true] %s294_s18 }
  0x1b   : > { %1776 = dma.hbm_to_vmem [thread:$0]  (!%p2303_p5), %s295_s18, 512, %s297_s21, [#allocation9], %s2765_s23, %s2765_s23, %s2766_s24  }
  0x1c   : > { %p57_p9 = scmp.eq.s32.totalorder %s2192_s14, 0  ;;  %p62_p10 = scmp.ne.s32.totalorder %s2176_s10, %s2172_s30 }
  0x1d   : > { %s2821_s26 = smov (%p44_p7, %s42_s26), 0  ;;  %p270_p13 = scmp.eq.s32.totalorder %s2287_s15, 1 }
  0x1e   : > { %2790 = sst [smem:[#allocation23_spill]] %s2821_s26  ;;  %p2323_p11 = por %p57_p9, %p56_p8 }
  0x1f   : > { %p2329_p12 = por %p63_p1, %p62_p10  ;;  %s46_s16 = ssub.s32 %s2188_s13, %s2821_s26 }
  0x20   : > { %p47_p0 = scmp.eq.s32.totalorder %s46_s16, 0  ;;  %p276_p2 = scmp.eq.s32.totalorder %s1587_s25, 1 }
  0x21   : > { %p2336_p4 = por %p270_p13, %p56_p8  ;;  %p1800_p7 = scmp.lt.s32.totalorder %s2192_s14, 2 }
  0x22   : > { %s2342_s18 = scalar_select %p47_p0, %s2180_s11, %s49_s27  }
  0x23   : > { %s2793_s17 = scalar_select %p2336_p4, 1, 0 }
  0x24   : > { %2795 = sst [smem:[#allocation25_spill]] %s2342_s18  ;;  %p2344_p9 = por %p276_p2, %p62_p10 }
  0x25   : > { %2794 = sst [smem:[#allocation24_spill]] %s2793_s17  ;;  %s2349_s21 = sand.u32 1, %s2180_s11  }
  0x26   : > { %s2796_s20 = scalar_select %p2344_p9, 1, 0 }
  0x27   : > { %s2776_s23 = sshll.u32 %s2349_s21, 3  ;;  %s2777_s24 = sshll.u32 %s2188_s13, 3 }
  0x28   : > { %2797 = sst [smem:[#allocation26_spill]] %s2796_s20  ;;  %p2355_p6 = pnand %p1800_p7, %p2323_p11 }
  0x29   : > { %s366_s16 = sand.u32 1, %s2192_s14   ;;  %s2799_s1 = sld [smem:[#allocation27_spill]] }
  0x2a   : > { %s370_s11 = scalar_lea.vmem [#allocation5], %s2776_s23  ;;  %s2367_s30 = scalar_lea.sflag [#allocation6], %s366_s16 }
  0x2b   : > { %s379_s20 = sshll.u32 %s370_s11, 4  ;;  %s1597_s28 = sshll.u32 %s2349_s21, 6  ;;  %s380_s20 = int_to_ptr.vmem [resolvable:$true] %s379_s20 }
  0x2c   : > { %s2800_s5 = sld [smem:[#allocation29_spill]]  ;;  %s390_s3 = scalar_lea.vmem [#allocation7], %s1597_s28 }
  0x2d   : > { %s2197_s11 = smov [#allocation10]   ;;  %s2801_s7 = sld [smem:[#allocation30_spill]] }
  0x2e   : > { %s313_s27 = sshll.u32 %s2197_s11, 4  ;;  %s2200_s9 = smov [#allocation11]   ;;  %s314_s27 = int_to_ptr.vmem [resolvable:$true] %s313_s27 }
  0x2f   : > { %s375_s26 = scalar_lea.hbm %s2799_s1, %s2777_s24  ;;  %s330_s14 = sshll.u32 %s2200_s9, 4  ;;  %s331_s14 = int_to_ptr.vmem [resolvable:$true] %s330_s14 }
  0x30   : > { %s377_s18 = sshll.u32 %s375_s26, 4  ;;  %s400_s26 = sshll.u32 %s390_s3, 4  ;;  %s378_s18 = int_to_ptr.hbm [resolvable:$true] %s377_s18  ;;  %s401_s26 = int_to_ptr.vmem [resolvable:$true] %s400_s26 }
  0x31   : > { %1789 = dma.hbm_to_vmem [thread:$0]  (!%p2355_p6), %s378_s18, 128, %s380_s20, %s2367_s30  }
  0x32   : > { %s311_s17 = sshll.u32 %s2800_s5, 4  ;;  %s2198_s18 = smov 64   ;;  %s312_s17 = int_to_ptr.hbm [resolvable:$true] %s311_s17 }
  0x33   : > { %s328_s24 = sshll.u32 %s2801_s7, 4  ;;  %s2199_s20 = smov 4   ;;  %s329_s24 = int_to_ptr.hbm [resolvable:$true] %s328_s24 }
  0x34   : > { %1779 = dma.hbm_to_vmem [thread:$0]  (!%p2303_p5), %s312_s17, 1536, %s314_s27, [#allocation9], %s2198_s18, %s2198_s18, %s2199_s20  }
  0x35   : > { %1782 = dma.hbm_to_vmem [thread:$0]  (!%p2303_p5), %s329_s24, 512, %s331_s14, [#allocation12], %s2198_s18, %s2198_s18, %s2199_s20  }
  0x36   : > { %s2802_s28 = sshll.u32 %s2188_s13, 3  ;;  %s2803_s16 = sshll.u32 %s2349_s21, 3 }
  0x37   : > { %s355_s23 = scalar_lea.hbm %s2755_s0, %s2802_s28  ;;  %s351_s1 = scalar_lea.vmem [#allocation2], %s2803_s16 }
  0x38   : > { %s359_s5 = sshll.u32 %s351_s1, 4  ;;  %s357_s7 = sshll.u32 %s355_s23, 4  ;;  %s360_s5 = int_to_ptr.vmem [resolvable:$true] %s359_s5  ;;  %s358_s7 = int_to_ptr.hbm [resolvable:$true] %s357_s7 }
  0x39   : > { %s1727_s17 = sshll.u32 %s2188_s13, 6  ;;  %s348_s27 = scalar_lea.sflag [#allocation3], %s2349_s21 }
  0x3a   : > { %1786 = dma.hbm_to_vmem [thread:$0]  (!%p2355_p6), %s358_s7, 128, %s360_s5, %s348_s27  }
  0x3b   : > { %s397_s22 = scalar_lea.hbm %s2757_s2, %s1727_s17  ;;  %s2804_s18 = smov 8  }
  0x3c   : > { %s398_s24 = sshll.u32 %s397_s22, 4  ;;  %s2805_s20 = smov 128   ;;  %s399_s24 = int_to_ptr.hbm [resolvable:$true] %s398_s24 }
  0x3d   : > { %1792 = dma.hbm_to_vmem [thread:$0]  (!%p2355_p6), %s399_s24, 1024, %s401_s26, %s2367_s30, %s2805_s20, %s2805_s20, %s2804_s18  }
  0x3e   : > { %412 = sbr.rel (%p2295_p3) target bundleno = 1222 (0x4c6), region = 56  ;;  %s2406_s1 = sand.u32 (!%p2295_p3), 1, %s2176_s10  }
  0x3f   : > { %s1601_s5 = sshll.u32 (!%p2295_p3), %s2406_s1, 3  ;;  %s415_s7 = scalar_lea.sflag (!%p2295_p3), [#allocation3], %s2406_s1 }
  0x40   : > { %s2410_s12 = scalar_lea.vmem (!%p2295_p3), [#allocation2], %s1601_s5 }
  0x43   : > { %2151 = dma.done.wait (%p2329_p12), %s415_s7, 128  }
  0x44   : > { %2153 = vsyncadd (%p2329_p12), %s415_s7, 4294967168  ;;  %s424_s30 = sand.u32 1, %s2287_s15   ;;  %s2417_s21 = scalar_lea.vmem [#allocation5], %s1601_s5 }
  0x45   : > { %s425_s19 = scalar_lea.sflag [#allocation6], %s424_s30 }
  0x46   : > { %2155 = dma.done.wait (%p2329_p12), %s425_s19, 1152  }
  0x47   : > { %2157 = vsyncadd (%p2329_p12), %s425_s19, 4294966144  ;;  %s1603_s25 = sshll.u32 %s2406_s1, 6 }
  0x48   : > { %s2426_s26 = scalar_lea.vmem [#allocation7], %s1603_s25 }
  0x49   : > { %2159 = dma.done.wait (%p63_p1), [#allocation9], 2048  }
  0x4a   : > { %2161 = vsyncadd (%p63_p1), [#allocation9], 4294965248 }
  0x4b   : > { %2163 = dma.done.wait (%p63_p1), [#allocation12], 512  }
  0x4c   : > { %2165 = vsyncadd (%p63_p1), [#allocation12], 4294966784  ;;  %v1618_v0 = vld [vmem:[#allocation8 + $0x10] sm:$0xf]  ;;  %v1731_v1 = vld [vmem:[#allocation8 + $0x14] sm:$0xf0] }
  0x4d   : > { %v1610_v2 = vld [vmem:[#allocation8] sm:$0xf]  ;;  %v1619_v3 = vor.u32 %v1731_v1, %v1618_v0  ;;  %v1729_v4 = vld [vmem:[#allocation8 + $0x4] sm:$0xf0]  ;;  %v1735_v10 = vld [vmem:[#allocation10 + $0x18] sm:$0xff]  ;;  %vm540_vm0 = vcmask 261120  }
  0x4e   : > { %v2437_v5 = vld [vmem:[%s2426_s26] sm:$0xff]  ;;  %v1611_v6 = vor.u32 %v1729_v4, %v1610_v2  ;;  %v2440_v7 = vld [vmem:[%s2426_s26 + $0x8] sm:$0xff]  ;;  %v1734_v13 = vld [vmem:[#allocation10 + $0x10] sm:$0xff]  ;;  %vm711_vm1 = vcmask 523264   ;;  %s2201_s3 = smov 64   ;;  %s2202_s22 = smov 32  }
  0x4f   : > { %559 = vmatpush.bf16.msra.mxu0 %v1619_v3  ;;  %1749 = vmatpush.bf16.msra.mxu2 %v1619_v3  ;;  %v2443_v8 = vld [vmem:[%s2426_s26 + $0x20] sm:$0xff]  ;;  %v2446_v9 = vld [vmem:[%s2426_s26 + $0x28] sm:$0xff]  ;;  %v2450_v11 = vpack.c.bf16 %v2440_v7, %v2437_v5  ;;  %v2461_v14 = vld [vmem:[%s2426_s26 + $0x10] sm:$0xff]  ;;  %s2203_s24 = smov 96   ;;  %s2806_s18 = sld [smem:[#allocation21_spill]] }
  0x50   : > { %v2454_v12 = vpack.c.bf16 %v2446_v9, %v2443_v8  ;;  %v2464_v15 = vld [vmem:[%s2426_s26 + $0x18] sm:$0xff]  ;;  %v2467_v16 = vld [vmem:[%s2426_s26 + $0x30] sm:$0xff]  ;;  %v1733_v20 = vld [vmem:[#allocation10 + $0x8] sm:$0xff]  ;;  %s498_s20 = scalar_lea.vmem [#allocation13], %s1603_s25  ;;  %s2808_s19 = sld [smem:[#allocation31_spill]] }
  0x51   : > { %v2470_v17 = vld [vmem:[%s2426_s26 + $0x38] sm:$0xff]  ;;  %v2474_v18 = vpack.c.bf16 %v2464_v15, %v2461_v14  ;;  %v1732_v21 = vld [vmem:[#allocation10] sm:$0xff]  ;;  %v1730_v53 = vld [vmem:[#allocation8 + $0x14] sm:$0xf]  ;;  %s1423_s25 = sshll.u32 %s498_s20, 4  ;;  %s1409_s15 = scalar_lea.sflag [#allocation4], %s2406_s1  ;;  %s1424_s25 = int_to_ptr.vmem [resolvable:$true] %s1423_s25 }
  0x52   : > { %v2478_v19 = vpack.c.bf16 %v2470_v17, %v2467_v16  ;;  %v2485_v23 = vld [vmem:[%s2410_s12] sm:$0xff]  ;;  %v2488_v24 = vld [vmem:[%s2417_s21] sm:$0xff] }
  0x53   : > { %560 = vmatpush.bf16.msra.mxu0 %v1611_v6  ;;  %1750 = vmatpush.bf16.msra.mxu2 %v1611_v6  ;;  %v632_v25 = vrot.slane %v2488_v24, 1  ;;  %v639_v27 = vperm.slane %v2488_v24, 0  ;;  %v633_v37 = vrot.slane %v2488_v24, 2  ;;  %v634_v39 = vrot.slane %v2488_v24, 3  ;;  %v1620_v54 = vld [vmem:[#allocation8 + $0x18] sm:$0xf0] }
  0x54   : > { %v635_v50 = vrot.slane %v2488_v24, 4  ;;  %v636_v51 = vrot.slane %v2488_v24, 5  ;;  %v1728_v55 = vld [vmem:[#allocation8 + $0x4] sm:$0xf]  ;;  %v1623_v56 = vor.u32 %v1730_v53, %v1620_v54  ;;  %v1612_v57 = vld [vmem:[#allocation8 + $0x8] sm:$0xf0] }
  0x55   : > { %v640_v28 = vperm.slane %v632_v25, 0  ;;  %v641_v41 = vperm.slane %v633_v37, 0  ;;  %v642_v42 = vperm.slane %v634_v39, 0  ;;  %v1615_v62 = vor.u32 %v1728_v55, %v1612_v57  ;;  %v1739_v63 = vld [vmem:[#allocation10 + $0x38] sm:$0xff]  ;;  %v1738_v3 = vld [vmem:[#allocation10 + $0x30] sm:$0xff]  ;;  %s1748_s7 = sshll.u32 %s2806_s18, 6 }
  0x56   : > { %1624 = vmatmul.msk.bf16.vlgmr.msra.gmra.mxu0 %vm540_vm0, %v2450_v11  ;;  %1626 = vmatmul.msk.bf16.vlgmr.msra.gmra.mxu2 %vm540_vm0, %v2454_v12  ;;  %v643_v59 = vperm.slane %v635_v50, 0  ;;  %v644_v61 = vperm.slane %v636_v51, 0  ;;  %v1742_v51 = vld [vmem:[#allocation10 + $0x50] sm:$0xff]  ;;  %s1422_s21 = scalar_lea.hbm %s2808_s19, %s1748_s7  ;;  %s2118_s11 = scalar_lea.hbm %s2808_s19, 128 }
  0x57   : > { %728 = vmatpush.bf16.msrb.mxu2 %v1735_v10  ;;  %588 = vmatpush.bf16.msra.mxu1 %v1623_v56  ;;  %v1737_v10 = vld [vmem:[#allocation10 + $0x28] sm:$0xff]  ;;  %s1425_s26 = sshll.u32 %s1422_s21, 4  ;;  %s1426_s26 = int_to_ptr.hbm [resolvable:$true] %s1425_s26 }
  0x58   : > { %1751 = vmatpush.bf16.msra.mxu3 %v1623_v56  ;;  %s2112_s29 = sshra.s32 %s1426_s26, 4  ;;  %s2113_s29 = int_to_ptr.hbm [resolvable:$true] %s2112_s29 }
  0x59   : > { %s2114_s14 = scalar_lea.hbm %s2113_s29, 64  ;;  %p2119_p6 = scmp.lt.s32.totalorder %s2113_s29, %s2808_s19 }
  0x5a   : > { %p2115_p1 = scmp.ne.s32.totalorder %s2113_s29, %s2114_s14  ;;  %p2120_p8 = scmp.lt.s32.totalorder %s2118_s11, %s2114_s14 }
  0x5b   : > { %729 = vmatpush.bf16.msrb.mxu2 %v1734_v13  ;;  %589 = vmatpush.bf16.msra.mxu1 %v1615_v62  ;;  %v637_v13 = vrot.slane %v2488_v24, 6 }
  0x5c   : > { %1752 = vmatpush.bf16.msra.mxu3 %v1615_v62  ;;  %p2116_p3 = pnand %p2115_p1, %p2336_p4  ;;  %p2121_p10 = por %p2120_p8, %p2119_p6 }
  0x5e   : > { %1628 = vmatmul.msk.bf16.vlgmr.msra.gmra.mxu1 %vm540_vm0, %v2450_v11  ;;  %p2117_p5 = pneg %p2116_p3 }
  0x5f   : > { %730 = vmatpush.bf16.msrb.mxu2 %v1733_v20  ;;  %1630 = vmatmul.msk.bf16.vlgmr.msra.gmra.mxu3 %vm540_vm0, %v2454_v12  ;;  %v638_v20 = vrot.slane %v2488_v24, 7 }
  0x60   : > { %819 = vmatpush.bf16.msrb.mxu3 %v1739_v63  ;;  %p2122_p11 = pnand %p2121_p10, %p2117_p5 }
  0x61   : > { %v646_v11 = vperm.slane %v638_v20, 0 }
  0x63   : > { %731 = vmatpush.bf16.msrb.mxu2 %v1732_v21 }
  0x64   : > { %820 = vmatpush.bf16.msrb.mxu3 %v1738_v3 }
  0x66   : > { %1625 = vmatmul.msk.bf16.gmra.mxu0 %vm540_vm0, %v2474_v18  ;;  %1627 = vmatmul.msk.bf16.gmra.mxu2 %vm540_vm0, %v2478_v19 }
  0x68   : > { %821 = vmatpush.bf16.msrb.mxu3 %v1737_v10 }
  0x6e   : > { %1629 = vmatmul.msk.bf16.gmra.mxu1 %vm540_vm0, %v2474_v18 }
  0x6f   : > { %1631 = vmatmul.msk.bf16.gmra.mxu3 %vm540_vm0, %v2478_v19 }
  0xd3   : > { %v562_v22 = vpop.f32.mrf.mxu0 }
  0xd4   : > { %v623_v26 = vadd.f32 %v562_v22, %v2485_v23 }
  0xd6   : > { %v655_v30 = vadd.f32 %v639_v27, %v623_v26  ;;  %v645_v26 = vperm.slane %v637_v13, 0 }
  0xd8   : > { %v663_v33 = vmax.f32 %v655_v30, 0.0 }
  0xd9   : > { %v572_v38 = vpop.f32.mrf.mxu2 }
  0xda   : > { %v627_v58 = vadd.f32 %v572_v38, %v2485_v23 }
  0xdb   : > { %v564_v29 = vpop.f32.mrf.mxu0 }
  0xdc   : > { %v624_v31 = vadd.f32 %v564_v29, %v2485_v23  ;;  %v659_v1 = vadd.f32 %v643_v59, %v627_v58 }
  0xde   : > { %v656_v32 = vadd.f32 %v640_v28, %v624_v31  ;;  %v667_v4 = vmax.f32 %v659_v1, 0.0  ;;  %v1736_v31 = vld [vmem:[#allocation10 + $0x20] sm:$0xff] }
  0xdf   : > { %822 = vmatpush.bf16.msrb.mxu3 %v1736_v31 }
  0xe0   : > { %v664_v34 = vmax.f32 %v656_v32, 0.0 }
  0xe1   : > { %v574_v47 = vpop.f32.mrf.mxu2 }
  0xe2   : > { %v671_v35 = vpack.c.bf16 %v664_v34, %v663_v33  ;;  %v628_v60 = vadd.f32 %v574_v47, %v2485_v23  ;;  %v1743_v47 = vld [vmem:[#allocation10 + $0x58] sm:$0xff] }
  0xe3   : > { %v567_v36 = vpop.f32.mrf.mxu0  ;;  %910 = vmatpush.bf16.msrb.mxu0 %v1743_v47 }
  0xe4   : > { %1648 = vmatmul.msk.bf16.vlgmr.msrb.gmra.mxu2 %vm711_vm1, %v671_v35  ;;  %v625_v40 = vadd.f32 %v567_v36, %v2485_v23  ;;  %v660_v2 = vadd.f32 %v644_v61, %v628_v60 }
  0xe6   : > { %v657_v44 = vadd.f32 %v641_v41, %v625_v40  ;;  %v668_v6 = vmax.f32 %v660_v2, 0.0 }
  0xe7   : > { %911 = vmatpush.bf16.msrb.mxu0 %v1742_v51 }
  0xe8   : > { %v665_v48 = vmax.f32 %v657_v44, 0.0  ;;  %v673_v21 = vpack.c.bf16 %v668_v6, %v667_v4  ;;  %v591_v44 = vpop.f32.mrf.mxu1 }
  0xe9   : > { %v577_v0 = vpop.f32.mrf.mxu2 }
  0xea   : > { %v629_v25 = vadd.f32 %v577_v0, %v2485_v23 }
  0xeb   : > { %v569_v43 = vpop.f32.mrf.mxu0 }
  0xec   : > { %v626_v45 = vadd.f32 %v569_v43, %v2485_v23  ;;  %v661_v28 = vadd.f32 %v645_v26, %v629_v25 }
  0xee   : > { %v658_v46 = vadd.f32 %v642_v42, %v626_v45  ;;  %v669_v12 = vmax.f32 %v661_v28, 0.0  ;;  %v1866_v45 = vld [vmem:[%s2759_s4] ss:$0 sm:$0xff] }
  0xf0   : > { %v666_v49 = vmax.f32 %v658_v46, 0.0  ;;  %v601_v46 = vpop.f32.mrf.mxu3  ;;  %v593_v54 = vpop.f32.mrf.mxu1 }
  0xf1   : > { %v579_v22 = vpop.f32.mrf.mxu2  ;;  %v2528_v50 = vadd.f32 %v1866_v45, %v601_v46  ;;  %v2534_v57 = vadd.f32 %v1866_v45, %v593_v54 }
  0xf2   : > { %v672_v52 = vpack.c.bf16 %v666_v49, %v665_v48  ;;  %v630_v27 = vadd.f32 %v579_v22, %v2485_v23  ;;  %v1865_v23 = vld [vmem:[%s2761_s6] ss:$0 sm:$0xff]  ;;  %v2526_v49 = vadd.f32 %v1866_v45, %v591_v44 }
  0xf3   : > { %1200 = vrot.lane.b32.xlu2 %v2528_v50, %s2201_s3 }
  0xf4   : > { %1649 = vmatmul.msk.bf16.gmra.mxu2 %vm711_vm1, %v672_v52  ;;  %v662_v29 = vadd.f32 %v646_v11, %v630_v27  ;;  %1192 = vrot.lane.b32.xlu0 %v2526_v49, %s2201_s3  ;;  %v1741_v52 = vld [vmem:[#allocation10 + $0x48] sm:$0xff]  ;;  %v1740_v11 = vld [vmem:[#allocation10 + $0x40] sm:$0xff] }
  0xf5   : > { %912 = vmatpush.bf16.msrb.mxu0 %v1741_v52 }
  0xf6   : > { %v670_v30 = vmax.f32 %v662_v29, 0.0  ;;  %v1867_v29 = vld [vmem:[%s2761_s6 + $0x1] ss:$0 sm:$0xff] }
  0xf8   : > { %v674_v24 = vpack.c.bf16 %v670_v30, %v669_v12  ;;  %v603_v55 = vpop.f32.mrf.mxu3  ;;  %v596_v63 = vpop.f32.mrf.mxu1 }
  0xf9   : > { %v2536_v58 = vadd.f32 %v1866_v45, %v603_v55  ;;  %v2543_v2 = vadd.f32 %v1866_v45, %v596_v63  ;;  %913 = vmatpush.bf16.msrb.mxu0 %v1740_v11 }
  0xfb   : > { %1202 = vrot.lane.b32.xlu2 %v2536_v58, %s2201_s3  ;;  %1196 = vrot.lane.b32.xlu1 %v2543_v2, %s2201_s3 }
  0xfc   : > { %1194 = vrot.lane.b32.xlu0 %v2534_v57, %s2201_s3 }
 0x100   : > { %v606_v0 = vpop.f32.mrf.mxu3  ;;  %v598_v6 = vpop.f32.mrf.mxu1 }
 0x101   : > { %v2545_v3 = vadd.f32 %v1866_v45, %v606_v0  ;;  %v2551_v13 = vadd.f32 %v1866_v45, %v598_v6 }
 0x103   : > { %1198 = vrot.lane.b32.xlu1 %v2551_v13, %s2201_s3 }
 0x104   : > { %1650 = vmatmul.msk.bf16.gmra.mxu2 %vm711_vm1, %v673_v21  ;;  %1204 = vrot.lane.b32.xlu0 %v2545_v3, %s2201_s3 }
 0x108   : > { %v608_v25 = vpop.f32.mrf.mxu3 }
 0x109   : > { %v2555_v27 = vadd.f32 %v1866_v45, %v608_v25 }
 0x10b   : > { %1206 = vrot.lane.b32.xlu1 %v2555_v27, %s2201_s3 }
 0x114   : > { %1651 = vmatmul.msk.bf16.gmra.mxu2 %vm711_vm1, %v674_v24 }
 0x167   : > { %v733_v32 = vpop.f32.mrf.mxu2 }
 0x168   : > { %v734_v33 = vadd.f32 %v1865_v23, %v733_v32 }
 0x16a   : > { %v753_v36 = vmax.f32 %v734_v33, 0.0 }
 0x16f   : > { %v735_v34 = vpop.f32.mrf.mxu2 }
 0x170   : > { %v736_v35 = vadd.f32 %v1865_v23, %v735_v34 }
 0x172   : > { %v754_v37 = vmax.f32 %v736_v35, 0.0 }
 0x174   : > { %v761_v38 = vpack.c.bf16 %v754_v37, %v753_v36 }
 0x176   : > { %1669 = vmatmul.msk.bf16.vlgmr.msrb.gmra.mxu3 %vm711_vm1, %v761_v38 }
 0x177   : > { %v738_v18 = vpop.f32.mrf.mxu2 }
 0x178   : > { %v739_v19 = vadd.f32 %v1865_v23, %v738_v18 }
 0x17a   : > { %v755_v41 = vmax.f32 %v739_v19, 0.0  ;;  %v1747_v19 = vld [vmem:[#allocation11 + $0x18] sm:$0xff] }
 0x17b   : > { %999 = vmatpush.bf16.msrb.mxu1 %v1747_v19 }
 0x17f   : > { %v740_v39 = vpop.f32.mrf.mxu2 }
 0x180   : > { %v741_v40 = vadd.f32 %v1865_v23, %v740_v39 }
 0x182   : > { %v756_v42 = vmax.f32 %v741_v40, 0.0  ;;  %v1746_v40 = vld [vmem:[#allocation11 + $0x10] sm:$0xff] }
 0x183   : > { %1000 = vmatpush.bf16.msrb.mxu1 %v1746_v40 }
 0x184   : > { %v762_v43 = vpack.c.bf16 %v756_v42, %v755_v41  ;;  %v1745_v41 = vld [vmem:[#allocation11 + $0x8] sm:$0xff] }
 0x186   : > { %1670 = vmatmul.msk.bf16.gmra.mxu3 %vm711_vm1, %v762_v43 }
 0x187   : > { %v743_v48 = vpop.f32.mrf.mxu2  ;;  %1001 = vmatpush.bf16.msrb.mxu1 %v1745_v41 }
 0x188   : > { %v744_v53 = vadd.f32 %v1865_v23, %v743_v48 }
 0x18a   : > { %v757_v60 = vmax.f32 %v744_v53, 0.0 }
 0x18f   : > { %v745_v56 = vpop.f32.mrf.mxu2 }
 0x190   : > { %v746_v59 = vadd.f32 %v1865_v23, %v745_v56 }
 0x192   : > { %v758_v61 = vmax.f32 %v746_v59, 0.0  ;;  %v1744_v59 = vld [vmem:[#allocation11] sm:$0xff] }
 0x193   : > { %1002 = vmatpush.bf16.msrb.mxu1 %v1744_v59 }
 0x194   : > { %v763_v62 = vpack.c.bf16 %v758_v61, %v757_v60  ;;  %v1868_v61 = vld [vmem:[%s2761_s6 + $0x2] ss:$0 sm:$0xff] }
 0x196   : > { %1671 = vmatmul.msk.bf16.gmra.mxu3 %vm711_vm1, %v763_v62 }
 0x197   : > { %v748_v1 = vpop.f32.mrf.mxu2 }
 0x198   : > { %v749_v4 = vadd.f32 %v1865_v23, %v748_v1 }
 0x19a   : > { %v759_v21 = vmax.f32 %v749_v4, 0.0 }
 0x19f   : > { %v750_v10 = vpop.f32.mrf.mxu2 }
 0x1a0   : > { %v751_v20 = vadd.f32 %v1865_v23, %v750_v10 }
 0x1a2   : > { %v760_v22 = vmax.f32 %v751_v20, 0.0 }
 0x1a4   : > { %v764_v26 = vpack.c.bf16 %v760_v22, %v759_v21 }
 0x1a6   : > { %1672 = vmatmul.msk.bf16.gmra.mxu3 %vm711_vm1, %v764_v26 }
 0x1f9   : > { %v824_v28 = vpop.f32.mrf.mxu3 }
 0x1fa   : > { %v825_v12 = vadd.f32 %v1867_v29, %v824_v28 }
 0x1fc   : > { %v844_v31 = vmax.f32 %v825_v12, 0.0 }
 0x201   : > { %v826_v30 = vpop.f32.mrf.mxu3 }
 0x202   : > { %v827_v24 = vadd.f32 %v1867_v29, %v826_v30 }
 0x204   : > { %v845_v32 = vmax.f32 %v827_v24, 0.0 }
 0x206   : > { %v852_v23 = vpack.c.bf16 %v845_v32, %v844_v31 }
 0x208   : > { %1690 = vmatmul.msk.bf16.vlgmr.msrb.gmra.mxu0 %vm711_vm1, %v852_v23 }
 0x209   : > { %v829_v33 = vpop.f32.mrf.mxu3 }
 0x20a   : > { %v830_v34 = vadd.f32 %v1867_v29, %v829_v33 }
 0x20c   : > { %v846_v37 = vmax.f32 %v830_v34, 0.0 }
 0x211   : > { %v831_v35 = vpop.f32.mrf.mxu3 }
 0x212   : > { %v832_v36 = vadd.f32 %v1867_v29, %v831_v35 }
 0x214   : > { %v847_v38 = vmax.f32 %v832_v36, 0.0 }
 0x216   : > { %v853_v18 = vpack.c.bf16 %v847_v38, %v846_v37 }
 0x218   : > { %1691 = vmatmul.msk.bf16.gmra.mxu0 %vm711_vm1, %v853_v18  ;;  %v2577_v18 = vld [vmem:[%s2763_s8] ss:$0 sm:$0xff] }
 0x219   : > { %v834_v39 = vpop.f32.mrf.mxu3 }
 0x21a   : > { %v835_v42 = vadd.f32 %v1867_v29, %v834_v39 }
 0x21c   : > { %v848_v45 = vmax.f32 %v835_v42, 0.0 }
 0x221   : > { %v836_v43 = vpop.f32.mrf.mxu3 }
 0x222   : > { %v837_v44 = vadd.f32 %v1867_v29, %v836_v43 }
 0x224   : > { %v849_v46 = vmax.f32 %v837_v44, 0.0 }
 0x226   : > { %v854_v47 = vpack.c.bf16 %v849_v46, %v848_v45 }
 0x228   : > { %1692 = vmatmul.msk.bf16.gmra.mxu0 %vm711_vm1, %v854_v47 }
 0x229   : > { %v839_v48 = vpop.f32.mrf.mxu3 }
 0x22a   : > { %v840_v51 = vadd.f32 %v1867_v29, %v839_v48 }
 0x22c   : > { %v850_v54 = vmax.f32 %v840_v51, 0.0 }
 0x231   : > { %v841_v52 = vpop.f32.mrf.mxu3 }
 0x232   : > { %v842_v53 = vadd.f32 %v1867_v29, %v841_v52 }
 0x234   : > { %v851_v55 = vmax.f32 %v842_v53, 0.0 }
 0x236   : > { %v855_v56 = vpack.c.bf16 %v851_v55, %v850_v54 }
 0x238   : > { %1693 = vmatmul.msk.bf16.gmra.mxu0 %vm711_vm1, %v855_v56 }
 0x285   : > { %v915_v60 = vpop.f32.mrf.mxu0 }
 0x286   : > { %v916_v62 = vadd.f32 %v1868_v61, %v915_v60 }
 0x288   : > { %v935_v1 = vmax.f32 %v916_v62, 0.0 }
 0x28d   : > { %v917_v63 = vpop.f32.mrf.mxu0 }
 0x28e   : > { %v918_v0 = vadd.f32 %v1868_v61, %v917_v63 }
 0x290   : > { %v936_v4 = vmax.f32 %v918_v0, 0.0 }
 0x292   : > { %v943_v6 = vpack.c.bf16 %v936_v4, %v935_v1 }
 0x294   : > { %1710 = vmatmul.msk.bf16.vlgmr.msrb.gmra.mxu1 %vm711_vm1, %v943_v6 }
 0x295   : > { %v920_v10 = vpop.f32.mrf.mxu0 }
 0x296   : > { %v921_v20 = vadd.f32 %v1868_v61, %v920_v10  ;;  %v1193_v10 = vpop.permute.xlu0 %1192 }
 0x298   : > { %v937_v25 = vmax.f32 %v921_v20, 0.0 }
 0x29d   : > { %v922_v21 = vpop.f32.mrf.mxu0 }
 0x29e   : > { %v923_v22 = vadd.f32 %v1868_v61, %v922_v21 }
 0x2a0   : > { %v938_v26 = vmax.f32 %v923_v22, 0.0 }
 0x2a2   : > { %v944_v11 = vpack.c.bf16 %v938_v26, %v937_v25 }
 0x2a4   : > { %1711 = vmatmul.msk.bf16.gmra.mxu1 %vm711_vm1, %v944_v11 }
 0x2a5   : > { %v925_v28 = vpop.f32.mrf.mxu0 }
 0x2a6   : > { %v926_v29 = vadd.f32 %v1868_v61, %v925_v28 }
 0x2a8   : > { %v939_v24 = vmax.f32 %v926_v29, 0.0 }
 0x2ad   : > { %v927_v12 = vpop.f32.mrf.mxu0 }
 0x2ae   : > { %v928_v30 = vadd.f32 %v1868_v61, %v927_v12 }
 0x2b0   : > { %v940_v31 = vmax.f32 %v928_v30, 0.0 }
 0x2b2   : > { %v945_v32 = vpack.c.bf16 %v940_v31, %v939_v24 }
 0x2b4   : > { %1712 = vmatmul.msk.bf16.gmra.mxu1 %vm711_vm1, %v945_v32 }
 0x2b5   : > { %v930_v23 = vpop.f32.mrf.mxu0 }
 0x2b6   : > { %v931_v33 = vadd.f32 %v1868_v61, %v930_v23 }
 0x2b8   : > { %v941_v36 = vmax.f32 %v931_v33, 0.0 }
 0x2bd   : > { %v932_v34 = vpop.f32.mrf.mxu0 }
 0x2be   : > { %v933_v35 = vadd.f32 %v1868_v61, %v932_v34 }
 0x2c0   : > { %v942_v37 = vmax.f32 %v933_v35, 0.0 }
 0x2c2   : > { %v946_v38 = vpack.c.bf16 %v942_v37, %v941_v36 }
 0x2c4   : > { %1713 = vmatmul.msk.bf16.gmra.mxu1 %vm711_vm1, %v946_v38 }
 0x311   : > { %v1004_v19 = vpop.f32.mrf.mxu1 }
 0x312   : > { %v2580_v39 = vadd.f32 %v2577_v18, %v1004_v19  ;;  %v1195_v19 = vpop.permute.xlu0 %1194 }
 0x314   : > { %v1024_v40 = vadd.f32 %v2580_v39, %v2526_v49 }
 0x316   : > { %v1714_v41 = vmul.f32 -1.442695, %v1024_v40 }
 0x318   : > { %1870 = vpow2.f32 %v1714_v41 }
 0x319   : > { %v1006_v42 = vpop.f32.mrf.mxu1 }
 0x31a   : > { %v2585_v43 = vadd.f32 %v2577_v18, %v1006_v42 }
 0x31c   : > { %v1025_v44 = vadd.f32 %v2585_v43, %v2534_v57 }
 0x31e   : > { %v1871_v45 = vpop.eup %1870  ;;  %v1715_v46 = vmul.f32 -1.442695, %v1025_v44 }
 0x31f   : > { %v1056_v47 = vadd.f32 1.0, %v1871_v45 }
 0x320   : > { %1872 = vpow2.f32 %v1715_v46 }
 0x321   : > { %1874 = vrcp.f32 %v1056_v47  ;;  %v1009_v48 = vpop.f32.mrf.mxu1  ;;  %v1075_v61 = vand.u32 2147483648, %v1056_v47  ;;  %v1073_v0 = vand.u32 2147483647, %v1056_v47  ;;  %vm1069_vm3 = vweird.f32 %v1056_v47 }
 0x322   : > { %v2590_v51 = vadd.f32 %v2577_v18, %v1009_v48 }
 0x323   : > { %v1076_v21 = vor.u32 1.1754944e-38, %v1075_v61  ;;  %vm1074_vm5 = vcmp.eq.f32.partialorder %v1073_v0, 8.507059e+37 }
 0x324   : > { %v1026_v49 = vadd.f32 %v2590_v51, %v2543_v2 }
 0x326   : > { %v1873_v52 = vpop.eup %1872  ;;  %v1716_v53 = vmul.f32 -1.442695, %v1026_v49 }
 0x327   : > { %v1875_v54 = vpop.eup %1874  ;;  %v1057_v55 = vadd.f32 1.0, %v1873_v52 }
 0x328   : > { %1876 = vpow2.f32 %v1716_v53  ;;  %v1065_v56 = vmul.f32 %v1875_v54, %v1056_v47  ;;  %vm1070_vm2 = vweird.f32 %v1875_v54 }
 0x329   : > { %1878 = vrcp.f32 %v1057_v55  ;;  %v1011_v57 = vpop.f32.mrf.mxu1  ;;  %vm1071_vm4 = vmor %vm1069_vm3, %vm1070_vm2  ;;  %v1090_v12 = vand.u32 2147483648, %v1057_v55  ;;  %v1088_v31 = vand.u32 2147483647, %v1057_v55  ;;  %vm1084_vm7 = vweird.f32 %v1057_v55 }
 0x32a   : > { %v2595_v59 = vadd.f32 %v2577_v18, %v1011_v57  ;;  %v1066_v60 = vsub.f32 1.0, %v1065_v56 }
 0x32b   : > { %v1091_v36 = vor.u32 1.1754944e-38, %v1090_v12  ;;  %vm1089_vm9 = vcmp.eq.f32.partialorder %v1088_v31, 8.507059e+37 }
 0x32c   : > { %v1027_v62 = vadd.f32 %v2595_v59, %v2551_v13  ;;  %v1067_v63 = vmul.f32 %v1875_v54, %v1066_v60 }
 0x32e   : > { %v1877_v2 = vpop.eup %1876  ;;  %v1717_v1 = vmul.f32 -1.442695, %v1027_v62  ;;  %v1068_v4 = vadd.f32 %v1875_v54, %v1067_v63 }
 0x32f   : > { %v1879_v6 = vpop.eup %1878  ;;  %v1058_v20 = vadd.f32 1.0, %v1877_v2 }
 0x330   : > { %1880 = vpow2.f32 %v1717_v1  ;;  %v1072_v22 = vsel %vm1071_vm4, %v1875_v54, %v1068_v4  ;;  %v1080_v25 = vmul.f32 %v1879_v6, %v1057_v55  ;;  %vm1085_vm6 = vweird.f32 %v1879_v6  ;;  %v1197_v55 = vpop.permute.xlu1 %1196 }
 0x331   : > { %1882 = vrcp.f32 %v1058_v20  ;;  %v1014_v26 = vpop.f32.mrf.mxu1  ;;  %v2599_v11 = vsel %vm1074_vm5, %v1076_v21, %v1072_v22  ;;  %vm1086_vm8 = vmor %vm1084_vm7, %vm1085_vm6  ;;  %v1105_v45 = vand.u32 2147483648, %v1058_v20  ;;  %v1103_v48 = vand.u32 2147483647, %v1058_v20 }
 0x332   : > { %v2602_v13 = vadd.f32 %v2577_v18, %v1014_v26  ;;  %v1216_v28 = vmul.f32 %v1193_v10, %v2599_v11  ;;  %v1081_v29 = vsub.f32 1.0, %v1080_v25  ;;  %vm1099_vm11 = vweird.f32 %v1058_v20 }
 0x333   : > { %v1106_v57 = vor.u32 1.1754944e-38, %v1105_v45  ;;  %vm1104_vm13 = vcmp.eq.f32.partialorder %v1103_v48, 8.507059e+37 }
 0x334   : > { %v1028_v30 = vadd.f32 %v2602_v13, %v2528_v50  ;;  %1232 = vrot.lane.b32.xlu2 %v1216_v28, %s2201_s3  ;;  %v1082_v24 = vmul.f32 %v1879_v6, %v1081_v29 }
 0x336   : > { %v1881_v32 = vpop.eup %1880  ;;  %v1718_v23 = vmul.f32 -1.442695, %v1028_v30  ;;  %v1083_v33 = vadd.f32 %v1879_v6, %v1082_v24 }
 0x337   : > { %v1883_v34 = vpop.eup %1882  ;;  %v1059_v35 = vadd.f32 1.0, %v1881_v32 }
 0x338   : > { %1884 = vpow2.f32 %v1718_v23  ;;  %v1087_v37 = vsel %vm1086_vm8, %v1879_v6, %v1083_v33  ;;  %v1095_v38 = vmul.f32 %v1883_v34, %v1058_v20  ;;  %vm1100_vm10 = vweird.f32 %v1883_v34  ;;  %v1199_v30 = vpop.permute.xlu1 %1198 }
 0x339   : > { %1886 = vrcp.f32 %v1059_v35  ;;  %v1016_v50 = vpop.f32.mrf.mxu1  ;;  %v2608_v40 = vsel %vm1089_vm9, %v1091_v36, %v1087_v37  ;;  %vm1101_vm12 = vmor %vm1099_vm11, %vm1100_vm10  ;;  %v1120_v1 = vand.u32 2147483648, %v1059_v35  ;;  %v1118_v10 = vand.u32 2147483647, %v1059_v35 }
 0x33a   : > { %v2611_v41 = vadd.f32 %v2577_v18, %v1016_v50  ;;  %v1217_v42 = vmul.f32 %v1195_v19, %v2608_v40  ;;  %v1096_v44 = vsub.f32 1.0, %v1095_v38  ;;  %vm1114_vm15 = vweird.f32 %v1059_v35 }
 0x33b   : > { %v1121_v28 = vor.u32 1.1754944e-38, %v1120_v1  ;;  %vm1119_vm2 = vcmp.eq.f32.partialorder %v1118_v10, 8.507059e+37 }
 0x33c   : > { %v1029_v46 = vadd.f32 %v2611_v41, %v2536_v58  ;;  %1234 = vrot.lane.b32.xlu0 %v1217_v42, %s2201_s3  ;;  %v1097_v47 = vmul.f32 %v1883_v34, %v1096_v44  ;;  %v1201_v42 = vpop.permute.xlu2 %1200 }
 0x33e   : > { %v1885_v49 = vpop.eup %1884  ;;  %v1719_v52 = vmul.f32 -1.442695, %v1029_v46  ;;  %v1098_v53 = vadd.f32 %v1883_v34, %v1097_v47 }
 0x33f   : > { %v1887_v54 = vpop.eup %1886  ;;  %v1060_v56 = vadd.f32 1.0, %v1885_v49 }
 0x340   : > { %1888 = vpow2.f32 %v1719_v52  ;;  %v1102_v60 = vsel %vm1101_vm12, %v1883_v34, %v1098_v53  ;;  %v1110_v61 = vmul.f32 %v1887_v54, %v1059_v35  ;;  %vm1115_vm14 = vweird.f32 %v1887_v54 }
 0x341   : > { %1890 = vrcp.f32 %v1060_v56  ;;  %v1019_v58 = vpop.f32.mrf.mxu1  ;;  %v2617_v62 = vsel %vm1104_vm13, %v1106_v57, %v1102_v60  ;;  %vm1116_vm1 = vmor %vm1114_vm15, %vm1115_vm14  ;;  %v1135_v33 = vand.u32 2147483648, %v1060_v56  ;;  %v1133_v36 = vand.u32 2147483647, %v1060_v56 }
 0x342   : > { %v2620_v63 = vadd.f32 %v2577_v18, %v1019_v58  ;;  %v1218_v0 = vmul.f32 %v1197_v55, %v2617_v62  ;;  %v1111_v2 = vsub.f32 1.0, %v1110_v61  ;;  %vm1129_vm4 = vweird.f32 %v1060_v56 }
 0x343   : > { %v1136_v44 = vor.u32 1.1754944e-38, %v1135_v33  ;;  %vm1134_vm6 = vcmp.eq.f32.partialorder %v1133_v36, 8.507059e+37 }
 0x344   : > { %v1030_v4 = vadd.f32 %v2620_v63, %v2545_v3  ;;  %1236 = vrot.lane.b32.xlu1 %v1218_v0, %s2201_s3  ;;  %v1112_v6 = vmul.f32 %v1887_v54, %v1111_v2  ;;  %v1203_v0 = vpop.permute.xlu2 %1202 }
 0x346   : > { %v1889_v20 = vpop.eup %1888  ;;  %v1720_v21 = vmul.f32 -1.442695, %v1030_v4  ;;  %v1113_v22 = vadd.f32 %v1887_v54, %v1112_v6 }
 0x347   : > { %v1891_v25 = vpop.eup %1890  ;;  %v1061_v26 = vadd.f32 1.0, %v1889_v20 }
 0x348   : > { %1892 = vpow2.f32 %v1720_v21  ;;  %v1117_v29 = vsel %vm1116_vm1, %v1887_v54, %v1113_v22  ;;  %v1125_v12 = vmul.f32 %v1891_v25, %v1060_v56  ;;  %vm1130_vm3 = vweird.f32 %v1891_v25 }
 0x349   : > { %1894 = vrcp.f32 %v1061_v26  ;;  %v1021_v3 = vpop.f32.mrf.mxu1  ;;  %v2626_v24 = vsel %vm1119_vm2, %v1121_v28, %v1117_v29  ;;  %vm1131_vm5 = vmor %vm1129_vm4, %vm1130_vm3  ;;  %v1150_v49 = vand.u32 2147483648, %v1061_v26  ;;  %v1148_v53 = vand.u32 2147483647, %v1061_v26  ;;  %v1205_v29 = vpop.permute.xlu0 %1204 }
 0x34a   : > { %v2629_v31 = vadd.f32 %v2577_v18, %v1021_v3  ;;  %v1219_v32 = vmul.f32 %v1199_v30, %v2626_v24  ;;  %v1126_v23 = vsub.f32 1.0, %v1125_v12  ;;  %vm1144_vm8 = vweird.f32 %v1061_v26 }
 0x34b   : > { %v1151_v60 = vor.u32 1.1754944e-38, %v1150_v49  ;;  %vm1149_vm10 = vcmp.eq.f32.partialorder %v1148_v53, 8.507059e+37 }
 0x34c   : > { %v1031_v34 = vadd.f32 %v2629_v31, %v2555_v27  ;;  %1238 = vrot.lane.b32.xlu2 %v1219_v32, %s2201_s3  ;;  %v1127_v35 = vmul.f32 %v1891_v25, %v1126_v23 }
 0x34e   : > { %v1893_v37 = vpop.eup %1892  ;;  %v1721_v38 = vmul.f32 -1.442695, %v1031_v34  ;;  %v1128_v19 = vadd.f32 %v1891_v25, %v1127_v35 }
 0x34f   : > { %v1895_v50 = vpop.eup %1894  ;;  %v1062_v18 = vadd.f32 1.0, %v1893_v37  ;;  %v1207_v37 = vpop.permute.xlu1 %1206 }
 0x350   : > { %1896 = vpow2.f32 %v1721_v38  ;;  %v1132_v45 = vsel %vm1131_vm5, %v1891_v25, %v1128_v19  ;;  %v1140_v46 = vmul.f32 %v1895_v50, %v1061_v26  ;;  %vm1145_vm7 = vweird.f32 %v1895_v50 }
 0x351   : > { %1898 = vrcp.f32 %v1062_v18  ;;  %v2635_v27 = vsel %vm1134_vm6, %v1136_v44, %v1132_v45  ;;  %vm1146_vm9 = vmor %vm1144_vm8, %vm1145_vm7  ;;  %v1165_v6 = vand.u32 2147483648, %v1062_v18  ;;  %v1163_v20 = vand.u32 2147483647, %v1062_v18 }
 0x352   : > { %v1220_v47 = vmul.f32 %v1201_v42, %v2635_v27  ;;  %v1141_v48 = vsub.f32 1.0, %v1140_v46  ;;  %vm1159_vm12 = vweird.f32 %v1062_v18 }
 0x353   : > { %v1166_v25 = vor.u32 1.1754944e-38, %v1165_v6  ;;  %vm1164_vm14 = vcmp.eq.f32.partialorder %v1163_v20, 8.507059e+37  ;;  %v1275_v20 = vsub.f32 1.0, %v2626_v24 }
 0x354   : > { %1240 = vrot.lane.b32.xlu0 %v1220_v47, %s2201_s3  ;;  %v1142_v52 = vmul.f32 %v1895_v50, %v1141_v48 }
 0x356   : > { %v1897_v54 = vpop.eup %1896  ;;  %v1143_v55 = vadd.f32 %v1895_v50, %v1142_v52 }
 0x357   : > { %v1899_v56 = vpop.eup %1898  ;;  %v1063_v57 = vadd.f32 1.0, %v1897_v54 }
 0x358   : > { %v1147_v61 = vsel %vm1146_vm9, %v1895_v50, %v1143_v55  ;;  %v1155_v58 = vmul.f32 %v1899_v56, %v1062_v18  ;;  %vm1160_vm11 = vweird.f32 %v1899_v56 }
 0x359   : > { %1900 = vrcp.f32 %v1063_v57  ;;  %v2639_v2 = vsel %vm1149_vm10, %v1151_v60, %v1147_v61  ;;  %vm1161_vm13 = vmor %vm1159_vm12, %vm1160_vm11  ;;  %v1180_v32 = vand.u32 2147483648, %v1063_v57  ;;  %v1178_v33 = vand.u32 2147483647, %v1063_v57 }
 0x35a   : > { %v1221_v1 = vmul.f32 %v1203_v0, %v2639_v2  ;;  %v1156_v4 = vsub.f32 1.0, %v1155_v58  ;;  %vm1174_vm1 = vweird.f32 %v1063_v57 }
 0x35b   : > { %v1181_v35 = vor.u32 1.1754944e-38, %v1180_v32  ;;  %vm1179_vm3 = vcmp.eq.f32.partialorder %v1178_v33, 8.507059e+37 }
 0x35c   : > { %1242 = vrot.lane.b32.xlu1 %v1221_v1, %s2201_s3  ;;  %v1157_v10 = vmul.f32 %v1899_v56, %v1156_v4 }
 0x35e   : > { %v1158_v21 = vadd.f32 %v1899_v56, %v1157_v10 }
 0x35f   : > { %v1901_v22 = vpop.eup %1900 }
 0x360   : > { %v1162_v26 = vsel %vm1161_vm13, %v1899_v56, %v1158_v21  ;;  %v1170_v28 = vmul.f32 %v1901_v22, %v1063_v57  ;;  %vm1175_vm15 = vweird.f32 %v1901_v22  ;;  %v1272_v57 = vsub.f32 1.0, %v2599_v11 }
 0x361   : > { %v2643_v12 = vsel %vm1164_vm14, %v1166_v25, %v1162_v26  ;;  %vm1176_vm2 = vmor %vm1174_vm1, %vm1175_vm15  ;;  %v1276_v26 = vsub.f32 1.0, %v2635_v27 }
 0x362   : > { %v1222_v30 = vmul.f32 %v1205_v29, %v2643_v12  ;;  %v1171_v3 = vsub.f32 1.0, %v1170_v28 }
 0x364   : > { %1244 = vrot.lane.b32.xlu2 %v1222_v30, %s2201_s3  ;;  %1330 = vrot.lane.b32.xlu1 %v2440_v7, %s2202_s22  ;;  %v1172_v23 = vmul.f32 %v1901_v22, %v1171_v3  ;;  %v1274_v3 = vsub.f32 1.0, %v2617_v62 }
 0x366   : > { %v1173_v34 = vadd.f32 %v1901_v22, %v1172_v23 }
 0x368   : > { %v1177_v36 = vsel %vm1176_vm2, %v1901_v22, %v1173_v34 }
 0x369   : > { %v2649_v38 = vsel %vm1179_vm3, %v1181_v35, %v1177_v36 }
 0x36a   : > { %v1223_v19 = vmul.f32 %v1207_v37, %v2649_v38  ;;  %v1279_v35 = vsub.f32 1.0, %v2649_v38 }
 0x36c   : > { %1246 = vrot.lane.b32.xlu0 %v1223_v19, %s2201_s3  ;;  %1332 = vrot.lane.b32.xlu2 %v2461_v14, %s2202_s22 }
 0x36d   : > { %1336 = vrot.lane.b32.xlu1 %v2443_v8, %s2202_s22 }
 0x374   : > { %1328 = vrot.lane.b32.xlu0 %v2437_v5, %s2202_s22 }
 0x37c   : > { %1334 = vrot.lane.b32.xlu0 %v2464_v15, %s2202_s22 }
 0x38e   : > { %v1233_v7 = vpop.permute.xlu2 %1232 }
 0x38f   : > { %v1256_v50 = vadd.f32 %v1233_v7, %v2580_v39 }
 0x391   : > { %1902 = vtanh.f32 %v1256_v50  ;;  %v1277_v50 = vsub.f32 1.0, %v2639_v2 }
 0x397   : > { %v1903_v42 = vpop.eup %1902 }
 0x398   : > { %1288 = vrot.lane.b32.xlu1 %v1903_v42, %s2203_s24 }
 0x3a6   : > { %v1239_v18 = vpop.permute.xlu2 %1238 }
 0x3a7   : > { %v1259_v14 = vadd.f32 %v1239_v18, %v2595_v59 }
 0x3a9   : > { %1904 = vtanh.f32 %v1259_v14 }
 0x3ae   : > { %v1235_v44 = vpop.permute.xlu0 %1234 }
 0x3af   : > { %v1905_v8 = vpop.eup %1904  ;;  %v1257_v45 = vadd.f32 %v1235_v44, %v2585_v43 }
 0x3b0   : > { %1294 = vrot.lane.b32.xlu1 %v1905_v8, %s2203_s24  ;;  %v1278_v8 = vsub.f32 1.0, %v2643_v12 }
 0x3b1   : > { %1906 = vtanh.f32 %v1257_v45 }
 0x3b6   : > { %v1237_v5 = vpop.permute.xlu1 %1236 }
 0x3b7   : > { %v1907_v15 = vpop.eup %1906  ;;  %v1258_v39 = vadd.f32 %v1237_v5, %v2590_v51 }
 0x3b8   : > { %1290 = vrot.lane.b32.xlu2 %v1907_v15, %s2203_s24 }
 0x3b9   : > { %1908 = vtanh.f32 %v1258_v39 }
 0x3be   : > { %v1245_v46 = vpop.permute.xlu2 %1244 }
 0x3bf   : > { %v1909_v47 = vpop.eup %1908  ;;  %v1262_v48 = vadd.f32 %v1245_v46, %v2620_v63 }
 0x3c0   : > { %1292 = vrot.lane.b32.xlu0 %v1909_v47, %s2203_s24 }
 0x3c1   : > { %1910 = vtanh.f32 %v1262_v48 }
 0x3c6   : > { %v1241_v59 = vpop.permute.xlu0 %1240  ;;  %v1333_v60 = vpop.permute.xlu2 %1332 }
 0x3c7   : > { %v1911_v49 = vpop.eup %1910  ;;  %v1260_v43 = vadd.f32 %v1241_v59, %v2602_v13  ;;  %v1354_v23 = vmul.f32 %v1333_v60, %v2617_v62 }
 0x3c8   : > { %1300 = vrot.lane.b32.xlu1 %v1911_v49, %s2203_s24 }
 0x3c9   : > { %1912 = vtanh.f32 %v1260_v43 }
 0x3ce   : > { %v1243_v52 = vpop.permute.xlu1 %1242 }
 0x3cf   : > { %v1913_v53 = vpop.eup %1912  ;;  %v1261_v51 = vadd.f32 %v1243_v52, %v2611_v41 }
 0x3d0   : > { %1296 = vrot.lane.b32.xlu2 %v1913_v53, %s2203_s24  ;;  %1342 = vrot.lane.b32.xlu1 %v2470_v17, %s2202_s22 }
 0x3d1   : > { %1914 = vtanh.f32 %v1261_v51 }
 0x3d6   : > { %v1331_v41 = vpop.permute.xlu1 %1330 }
 0x3d7   : > { %v1915_v63 = vpop.eup %1914  ;;  %v1353_v4 = vmul.f32 %v1331_v41, %v2608_v40 }
 0x3d8   : > { %1298 = vrot.lane.b32.xlu0 %v1915_v63, %s2203_s24 }
 0x3de   : > { %v1247_v54 = vpop.permute.xlu0 %1246 }
 0x3df   : > { %v1263_v55 = vadd.f32 %v1247_v54, %v2629_v31  ;;  %v1337_v56 = vpop.permute.xlu1 %1336 }
 0x3e0   : > { %1340 = vrot.lane.b32.xlu0 %v2467_v16, %s2202_s22  ;;  %v1273_v16 = vsub.f32 1.0, %v2608_v40  ;;  %v1356_v29 = vmul.f32 %v1337_v56, %v2635_v27 }
 0x3e1   : > { %1916 = vtanh.f32 %v1263_v55 }
 0x3e6   : > { %v1329_v17 = vpop.permute.xlu0 %1328 }
 0x3e7   : > { %v1917_v13 = vpop.eup %1916  ;;  %v1352_v58 = vmul.f32 %v1329_v17, %v2599_v11 }
 0x3e8   : > { %1302 = vrot.lane.b32.xlu2 %v1917_v13, %s2203_s24 }
 0x3ee   : > { %v1335_v10 = vpop.permute.xlu0 %1334 }
 0x3ef   : > { %v1355_v22 = vmul.f32 %v1335_v10, %v2626_v24 }
 0x3f0   : > { %1338 = vrot.lane.b32.xlu2 %v2446_v9, %s2202_s22 }
 0x40a   : > { %v1289_v61 = vpop.permute.xlu1 %1288 }
 0x40b   : > { %v1312_v31 = vmul.f32 %v1289_v61, %v1272_v57 }
 0x40d   : > { %v1360_v0 = vadd.f32 %v1352_v58, %v1312_v31 }
 0x40f   : > { %1376 = vrot.lane.b32.xlu2 %v1360_v0, %s2203_s24 }
 0x412   : > { %v1291_v1 = vpop.permute.xlu2 %1290 }
 0x413   : > { %v1313_v6 = vmul.f32 %v1291_v1, %v1273_v16 }
 0x415   : > { %v1361_v9 = vadd.f32 %v1353_v4, %v1313_v6 }
 0x417   : > { %1378 = vrot.lane.b32.xlu0 %v1361_v9, %s2203_s24 }
 0x422   : > { %v1295_v21 = vpop.permute.xlu1 %1294 }
 0x423   : > { %v1315_v11 = vmul.f32 %v1295_v21, %v1275_v20 }
 0x425   : > { %v1363_v25 = vadd.f32 %v1355_v22, %v1315_v11 }
 0x427   : > { %1382 = vrot.lane.b32.xlu2 %v1363_v25, %s2203_s24 }
 0x42a   : > { %v1297_v28 = vpop.permute.xlu2 %1296 }
 0x42b   : > { %v1316_v40 = vmul.f32 %v1297_v28, %v1276_v26 }
 0x42d   : > { %v1364_v30 = vadd.f32 %v1356_v29, %v1316_v40 }
 0x42f   : > { %1384 = vrot.lane.b32.xlu0 %v1364_v30, %s2203_s24 }
 0x432   : > { %v1293_v32 = vpop.permute.xlu0 %1292 }
 0x433   : > { %v1314_v33 = vmul.f32 %v1293_v32, %v1274_v3 }
 0x435   : > { %v1362_v24 = vadd.f32 %v1354_v23, %v1314_v33 }
 0x437   : > { %1380 = vrot.lane.b32.xlu1 %v1362_v24, %s2203_s24 }
 0x43a   : > { %v1301_v34 = vpop.permute.xlu1 %1300 }
 0x43b   : > { %v1318_v5 = vmul.f32 %v1301_v34, %v1278_v8 }
 0x442   : > { %v1303_v36 = vpop.permute.xlu2 %1302  ;;  %v1343_v37 = vpop.permute.xlu1 %1342 }
 0x443   : > { %v1319_v19 = vmul.f32 %v1303_v36, %v1279_v35  ;;  %v1359_v27 = vmul.f32 %v1343_v37, %v2649_v38 }
 0x445   : > { %v1367_v7 = vadd.f32 %v1359_v27, %v1319_v19 }
 0x447   : > { %1390 = vrot.lane.b32.xlu0 %v1367_v7, %s2203_s24 }
 0x44a   : > { %v1339_v42 = vpop.permute.xlu2 %1338  ;;  %v1299_v62 = vpop.permute.xlu0 %1298 }
 0x44b   : > { %v1357_v18 = vmul.f32 %v1339_v42, %v2639_v2  ;;  %v1317_v14 = vmul.f32 %v1299_v62, %v1277_v50 }
 0x44d   : > { %v1365_v44 = vadd.f32 %v1357_v18, %v1317_v14 }
 0x44f   : > { %1386 = vrot.lane.b32.xlu1 %v1365_v44, %s2203_s24 }
 0x452   : > { %v1341_v45 = vpop.permute.xlu0 %1340 }
 0x453   : > { %v1358_v38 = vmul.f32 %v1341_v45, %v2643_v12 }
 0x455   : > { %v1366_v15 = vadd.f32 %v1358_v38, %v1318_v5 }
 0x457   : > { %1388 = vrot.lane.b32.xlu2 %v1366_v15, %s2203_s24 }
 0x469   : > { %v1377_v39 = vpop.permute.xlu2 %1376 }
 0x46a   : > { %1400 = vst.msk [vmem:[%s498_s20] sm:$0xff] %vm540_vm0, %v1377_v39 }
 0x481   : > { %v1383_v2 = vpop.permute.xlu2 %1382 }
 0x482   : > { %1403 = vst.msk [vmem:[%s498_s20 + $0x18] sm:$0xff] %vm540_vm0, %v1383_v2 }
 0x489   : > { %v1379_v46 = vpop.permute.xlu0 %1378 }
 0x48a   : > { %1401 = vst.msk [vmem:[%s498_s20 + $0x8] sm:$0xff] %vm540_vm0, %v1379_v46 }
 0x4a1   : > { %v1385_v47 = vpop.permute.xlu0 %1384 }
 0x4a2   : > { %1404 = vst.msk [vmem:[%s498_s20 + $0x20] sm:$0xff] %vm540_vm0, %v1385_v47 }
 0x4a9   : > { %v1381_v12 = vpop.permute.xlu1 %1380 }
 0x4aa   : > { %1402 = vst.msk [vmem:[%s498_s20 + $0x10] sm:$0xff] %vm540_vm0, %v1381_v12 }
 0x4b1   : > { %v1389_v48 = vpop.permute.xlu2 %1388 }
 0x4b2   : > { %1406 = vst.msk [vmem:[%s498_s20 + $0x30] sm:$0xff] %vm540_vm0, %v1389_v48 }
 0x4b9   : > { %v1391_v59 = vpop.permute.xlu0 %1390 }
 0x4ba   : > { %1407 = vst.msk [vmem:[%s498_s20 + $0x38] sm:$0xff] %vm540_vm0, %v1391_v59 }
 0x4c1   : > { %v1387_v49 = vpop.permute.xlu1 %1386 }
 0x4c2   : > { %1405 = vst.msk [vmem:[%s498_s20 + $0x28] sm:$0xff] %vm540_vm0, %v1387_v49 }
 0x4c3   : > { %2125 = shalt.err (!%p2122_p11)
}
 0x4c4   : > { %s2204_s1 = smov 128   ;;  %s2205_s17 = smov 8  }
 0x4c5   : > { %1771 = dma.vmem_to_hbm [thread:$0]  (%p2336_p4), %s1424_s25, 1024, %s1426_s26, %s1409_s15, %s2204_s1, %s2204_s1, %s2205_s17  }
 0x4c6 PF: > { %s2809_s27 = sld [smem:[#allocation19_spill]] }
 0x4c7   : > { %s2811_s22 = sld [smem:[#allocation22_spill]] }
 0x4cc   : > { %s1440_s24 = sand.u32 1, %s2809_s27  }
 0x4cd   : > { %p2812_p12 = scmp.ge.s32.totalorder %s2811_s22, 2  ;;  %s1441_s18 = scalar_lea.sflag [#allocation4], %s1440_s24 }
 0x4cf   : > { %p1794_p13 = pnand %p2812_p12, %p2344_p9 }
 0x4d1   : > { %p1795_p0 = pneg %p1794_p13 }
 0x4d3   : > { %2167 = dma.done.wait (%p1795_p0), %s1441_s18, 1024  }
 0x4d4   : > { %2169 = vsyncadd (%p1795_p0), %s1441_s18, 4294966272  ;;  %s30_s14 = sadd.s32 1, %s2811_s22   ;;  %s2813_s20 = sld [smem:[#allocation20_spill]] }
 0x4d5   : > { %p27_p2 = scmp.ge.s32.totalorder %s30_s14, 4   ;;  %s2814_s11 = sld [smem:[#allocation25_spill]] }
 0x4d6   : > { %s2815_s5 = sld [smem:[#allocation23_spill]]  ;;  %s2816_s30 = smov %s2176_s10 }
 0x4d7   : > { %s2818_s12 = smov %s2188_s13 }
 0x4d8   :  { %29 = sbr.rel (!%p27_p2) target bundleno = 16 (0x10), region = 141 }
 0x4da   : > { %s2817_s10 = smov %s2813_s20 }
 0x4dc   : > { %s2819_s13 = smov %s2815_s5 }
 0x4dd   :  { %1447 = vsyncpa [#allocation3], 1 }
 0x4de   :  { %1449 = vsyncpa [#allocation3 + $0x1], 1 }
 0x4df   :  { %1450 = vsyncpa [#allocation6], 1 }
 0x4e0   :  { %1452 = vsyncpa [#allocation6 + $0x1], 1 }
 0x4e1   :  { %1453 = vsyncpa [#allocation9], 1 }
 0x4e2   :  { %1454 = vsyncpa [#allocation12], 1 }
 0x4e3   :  { %1455 = vsyncpa [#allocation4], 1 }
 0x4e4   :  { %1457 = vsyncpa [#allocation4 + $0x1], 1 }

</bundles_post_ra>
